<compile_context>
chip_gen: v7x
topology: tpu7x:2x2x1
jax: 0.10.0
libtpu: 0.0.40
codegen_flags: <defaults>
</compile_context>

<pallas_src>
import functools

import jax
import jax.numpy as jnp
from jax.experimental import pallas as pl
from jax.experimental.pallas import tpu as pltpu


def _round_up(n, m):
    return ((n + m - 1) // m) * m


def _pad_last(a, mult):
    pad = (-a.shape[-1]) % mult
    if pad:
        a = jnp.pad(a, [(0, 0)] * (a.ndim - 1) + [(0, pad)])
    return a


def _vmem_limit_bytes():
    """Per-generation scoped-VMEM budget (v5e/v6e: 128 MiB physical, v7x: 64 MiB)."""
    cap = 64 * 1024 * 1024
    try:
        cap = int(getattr(pltpu.get_tpu_info(), "vmem_capacity_bytes", cap))
    except Exception:
        pass
    return int(min(cap * 3 // 4, 100 * 1024 * 1024))


def _pick_tiles(B, Sf, Df, K, KI, Gp, Op, vmem_limit):
    """Pick (tb, ts): large streaming tiles that fit the VMEM budget, keep B//tb >= 2
    (so the parallel batch axis can shard across v7x's two TensorCores) and cap tb at
    128 so the once-per-batch-tile finalize epilogue stays out of VMEM spill."""
    budget = vmem_limit // 2  # headroom for compiler-internal scratch / output buffers

    tb_cands = [d for d in range(1, min(B, 128) + 1) if B % d == 0]
    pref = [d for d in tb_cands if B // d >= 2]
    tb = (pref or tb_cands)[-1]

    # ts must divide Sf and (unless it spans the whole axis) be a multiple of 8 (f32 sublanes).
    ts_cands = sorted({Sf} | {d for d in range(8, Sf, 8) if Sf % d == 0}, reverse=True)
    fixed = (Df * Gp * 4 + Gp * 4          # resident gate weight + bias
             + 2 * tb * (KI + K) * 4       # indices + mask bias (double-buffered)
             + 2 * tb * K * Op * 2         # bf16 expert outputs (double-buffered)
             + tb * (Gp + Op) * 4          # resident output blocks
             + tb * Df * 4)                # f32 x-sum scratch
    ts = ts_cands[-1]
    for cand in ts_cands:
        if 2 * tb * cand * Df * 4 + fixed <= budget:   # double-buffered f32 x block
            ts = cand
            break
    return tb, ts


# ----------------------------------------------------------------------------
# Fused kernel: sequence pre-reduction + gating projection + expert-score gather
#               + masked softmax + weighted expert combination.
# Grid: (B // tb, Sf // ts); the sequence axis is a reduction (f32 x-sum scratch).
# ----------------------------------------------------------------------------
def _fused_moe_kernel(x_ref, w_ref, gate_b_ref, fidx_ref, mbias_ref, outs_ref,
                      scores_out_ref, avg_out_ref, xsum_ref, *, inv_s):
    s_step = pl.program_id(1)
    n_s = pl.num_programs(1)

    TB = x_ref.shape[0]
    Gp = w_ref.shape[1]            # grid-score width, padded to a multiple of 128
    K = mbias_ref.shape[1]         # experts per sample
    ND = fidx_ref.shape[1] // K    # number of grid dimensions
    Op = avg_out_ref.shape[1]      # expert output width, padded to a multiple of 128

    @pl.when(s_step == 0)
    def _init():
        xsum_ref[...] = jnp.zeros_like(xsum_ref)

    # Per-step work: f32 VPU sum of the (lane-folded) x tile over its sequence axis.
    # This is the only thing on the x-streaming critical path; the matmul is deferred.
    xsum_ref[...] += x_ref[...].sum(axis=1)

    @pl.when(s_step == n_s - 1)
    def _finalize():
        # --- step 1: gate projection, once per batch tile, on the MXU ------------
        # The lane-fold is undone implicitly: w_ref holds r stacked copies of W^T,
        # so (folded x-sum) @ w_ref == (full sequence sum of x) @ W^T.
        scores = (jnp.dot(xsum_ref[...], w_ref[...],
                          preferred_element_type=jnp.float32) * inv_s
                  + gate_b_ref[...])                                   # [TB, Gp] f32
        scores_out_ref[...] = scores                                   # lane-dense store

        # --- step 3: compute_expert_scores (in-kernel vectorized gather) ---------
        fidx = fidx_ref[...]                                           # [TB, K*ND] i32
        gid = jax.lax.broadcasted_iota(jnp.int32, (TB, Gp), 1)
        cols = []
        for k in range(K):
            lk = jnp.zeros((TB, 1), jnp.float32)
            for d in range(ND):
                idx_col = fidx[:, k * ND + d][:, None]                 # [TB, 1]
                lk = lk + jnp.sum(jnp.where(gid == idx_col, scores, 0.0),
                                  axis=1, keepdims=True)
            cols.append(lk)
        logits = jnp.concatenate(cols, axis=1)                         # [TB, K]

        # --- step 4: masked softmax (additive -1e30 bias; NaN-safe) --------------
        logits = logits + mbias_ref[...]
        m = jnp.max(logits, axis=1, keepdims=True)
        e = jnp.exp(logits - m)
        w_soft = e / jnp.sum(e, axis=1, keepdims=True)                 # exact; once per tile

        # --- step 5: weighted combination, unrolled over K (no [TB,K,O] temp) ----
        acc_out = jnp.zeros((TB, Op), jnp.float32)
        for k in range(K):
            acc_out = acc_out + (w_soft[:, k:k + 1]
                                 * outs_ref[:, k * Op:(k + 1) * Op].astype(jnp.float32))
        avg_out_ref[...] = acc_out                                     # lane-dense store


def remote_moe_forward(x, proj_w, proj_b, grid_size, grid_indices, expert_mask,
                       expert_outputs, *, tb=None, ts=None):
    """Fused RemoteMixtureOfExperts forward hot path.

    x:              [B, S, D] f32 gating input (batch-first).
    proj_w, proj_b: nn.Linear(D, sum(grid_size)) params, weight [G, D], bias [G].
    grid_indices:   [B, K, n_dims] i32 chosen expert grid coordinates (from beam search).
    expert_mask:    [B, K] bool, True where the remote expert responded.
    expert_outputs: [B, K, O] f32 per-expert outputs (dead experts zeroed).
    Returns (grid_scores_concat [B, G], averaged_output [B, O]).
    """
    B, S, D = x.shape
    G = proj_w.shape[0]
    K, O = expert_outputs.shape[1], expert_outputs.shape[2]
    ND = len(grid_size)
    Gp = _round_up(G, 128)
    Op = _round_up(O, 128)
    KI = K * ND

    # Lane-density fold: when D < 128, pack r consecutive sequence positions into the
    # lane dim (row-major reshape => free view) so the per-step sum / DMA use full vregs.
    r = 1
    if D < 128 and 128 % D == 0 and S % (128 // D) == 0:
        r = 128 // D
    Sf, Df = S // r, D * r
    x_folded = x.reshape(B, Sf, Df)                                    # no data movement

    vmem_limit = _vmem_limit_bytes()
    tb_auto, ts_auto = _pick_tiles(B, Sf, Df, K, KI, Gp, Op, vmem_limit)
    tb = tb_auto if tb is None else tb
    ts = ts_auto if ts is None else ts
    assert B % tb == 0, "batch must be divisible by the batch tile"
    assert Sf % ts == 0, "(folded) sequence must be divisible by the sequence tile"
    assert ts == Sf or ts % 8 == 0, "sequence tile must keep (8,128) alignment"

    # Folded gate weight: r stacked copies of W^T so (folded x-sum) @ w == x-sum @ W^T.
    # Kept in f32 (resident, tiny, off the critical path after the pre-reduction).
    w_p = _pad_last(jnp.tile(proj_w.T.astype(jnp.float32), (r, 1)), 128)      # [Df, Gp]
    b_p = _pad_last(proj_b.reshape(1, G).astype(jnp.float32), 128)            # [1, Gp]

    # Flatten per-dim grid indices into offsets within the concatenated score vector.
    offs = [0]
    for g in grid_size[:-1]:
        offs.append(offs[-1] + g)
    offs = jnp.asarray(offs, jnp.int32)
    flat_idx = (grid_indices.astype(jnp.int32) + offs[None, None, :]).reshape(B, KI)

    # Additive mask bias: 0 alive, -1e30 dead (finite -> no NaN if a row is all dead;
    # documented divergence from the -inf reference, which would produce NaN there).
    mask_bias = jnp.where(expert_mask, 0.0, -1e30).astype(jnp.float32)        # [B, K]
    # bf16, lane-dense [B, K*Op] slab for the expert outputs (halves their HBM traffic).
    outs2d = _pad_last(expert_outputs, 128).astype(jnp.bfloat16).reshape(B, K * Op)

    grid = (B // tb, Sf // ts)   # reduction (sequence) axis LAST -- required by pl.when init
    kernel = functools.partial(_fused_moe_kernel, inv_s=1.0 / float(S))
    scores_pad, avg_pad = pl.pallas_call(
        kernel,
        out_shape=(jax.ShapeDtypeStruct((B, Gp), jnp.float32),
                   jax.ShapeDtypeStruct((B, Op), jnp.float32)),
        grid_spec=pltpu.PrefetchScalarGridSpec(
            num_scalar_prefetch=0,
            grid=grid,
            in_specs=[
                pl.BlockSpec((tb, ts, Df), lambda i, s: (i, s, 0)),   # x (f32, folded)
                pl.BlockSpec((Df, Gp), lambda i, s: (0, 0)),          # gate weight (resident)
                pl.BlockSpec((1, Gp), lambda i, s: (0, 0)),           # gate bias (resident)
                pl.BlockSpec((tb, KI), lambda i, s: (i, 0)),          # flat grid indices
                pl.BlockSpec((tb, K), lambda i, s: (i, 0)),           # mask bias
                pl.BlockSpec((tb, K * Op), lambda i, s: (i, 0)),      # expert outputs (bf16)
            ],
            out_specs=[
                pl.BlockSpec((tb, Gp), lambda i, s: (i, 0)),          # grid scores
                pl.BlockSpec((tb, Op), lambda i, s: (i, 0)),          # averaged output
            ],
            scratch_shapes=[pltpu.VMEM((tb, Df), jnp.float32)],       # f32 x-sum accumulator
        ),
        compiler_params=pltpu.CompilerParams(
            dimension_semantics=("parallel", "arbitrary"),
            vmem_limit_bytes=vmem_limit,
        ),
    )(x_folded, w_p, b_p, flat_idx, mask_bias, outs2d)

    return scores_pad[:, :G], avg_pad[:, :O]


if __name__ == "__main__":
    key = jax.random.PRNGKey(0)
    B, S, D = 32, 32, 32        # batch, seq, in_features (small demo shapes)
    grid_size = (4, 4, 8)       # expert uid grid -> proj out = sum(grid_size)
    G = sum(grid_size)
    K = 4                       # k_best experts per sample
    O = 32                      # expert output features
    ND = len(grid_size)

    k_x, k_w, k_b, k_out = jax.random.split(key, 4)
    x = jax.random.normal(k_x, (B, S, D), jnp.float32)

    # nn.Linear(in_features, sum(grid_size)): weight [G, D], bias [G]
    bound = 1.0 / jnp.sqrt(jnp.float32(D))
    w = (jax.random.uniform(k_w, (G, D), jnp.float32) * 2.0 - 1.0) * bound
    b = (jax.random.uniform(k_b, (G,), jnp.float32) * 2.0 - 1.0) * bound

    # --- expert selection / remote calls (simulated) --------------------------
    # TODO(synk): MoEBeamSearcher DHT beam search has no Pallas equivalent; chosen
    # expert grid indices are generated deterministically here.
    bi = jnp.arange(B, dtype=jnp.int32)[:, None]
    ki = jnp.arange(K, dtype=jnp.int32)[None, :]
    grid_indices = jnp.stack([(bi + ki) % g for g in grid_size], axis=-1)     # [B, K, ND]

    # TODO(synk): _RemoteCallMany gRPC expert dispatch has no Pallas equivalent;
    # alive-mask and per-expert outputs are simulated deterministically.
    expert_mask = ((bi + ki) % 5 != 0)                                        # [B, K] bool
    expert_outputs = jax.random.normal(k_out, (B, K, O), jnp.float32)
    expert_outputs = jnp.where(expert_mask[:, :, None], expert_outputs, 0.0)  # dead -> zeros

    # --- fused Pallas forward (gating + gather + masked softmax + combine) ----
    scores_concat, averaged = remote_moe_forward(
        x, w, b, grid_size, grid_indices, expert_mask, expert_outputs)
    averaged = jax.block_until_ready(averaged)                                # [B, O]

    # --- reference check (pure JAX, full f32 module math) ---------------------
    ref_scores = jnp.mean(x, axis=1) @ w.T + b                                # [B, G]
    offs = [0]
    for g in grid_size[:-1]:
        offs.append(offs[-1] + g)
    ref_logits = jnp.zeros((B, K), jnp.float32)
    for d in range(ND):
        ref_logits = ref_logits + jnp.take_along_axis(
            ref_scores[:, offs[d]:offs[d] + grid_size[d]], grid_indices[:, :, d], axis=1)
    ref_masked = jnp.where(expert_mask, ref_logits, -jnp.inf)
    ref_w = jax.nn.softmax(ref_masked, axis=1)
    ref_out = jnp.sum(ref_w[:, :, None] * expert_outputs, axis=1)

    # f32 sequence pre-reduction + f32 gate weight + exact softmax reciprocal ->
    # only the MXU matmul rounding and bf16 expert outputs remain as error sources.
    assert jnp.allclose(scores_concat, ref_scores, atol=5e-3), "gating mismatch"
    assert jnp.allclose(averaged, ref_out, atol=2e-2), "combine mismatch"

    print("KERNEL_OK")
</pallas_src>

<mosaic_0001>
module attributes {stable_mosaic.version = 11 : i64} {
  func.func @_fused_moe_kernel(%arg0: i32, %arg1: i32, %arg2: memref<16x8x128xf32, #tpu.memory_space<vmem>>, %arg3: memref<128x128xf32, #tpu.memory_space<vmem>>, %arg4: memref<1x128xf32, #tpu.memory_space<vmem>>, %arg5: memref<16x12xi32, #tpu.memory_space<vmem>>, %arg6: memref<16x4xf32, #tpu.memory_space<vmem>>, %arg7: memref<16x512xbf16, #tpu.memory_space<vmem>>, %arg8: memref<16x128xf32, #tpu.memory_space<vmem>>, %arg9: memref<16x128xf32, #tpu.memory_space<vmem>>, %arg10: memref<16x128xf32, #tpu.memory_space<vmem>>) attributes {dimension_semantics = [#tpu.dimension_semantics<parallel>, #tpu.dimension_semantics<arbitrary>], iteration_bounds = array<i64: 2, 1>, scalar_prefetch = 0 : i64, scratch_operands = 1 : i64, tpu.core_type = #tpu.core_type<tc>, window_params = [{transform_indices = @transform_0, window_bounds = array<i64: 16, 8, 128>}, {pipeline_mode = #tpu.pipeline_mode<synchronous>, transform_indices = @transform_1, window_bounds = array<i64: 128, 128>}, {pipeline_mode = #tpu.pipeline_mode<synchronous>, transform_indices = @transform_2, window_bounds = array<i64: 1, 128>}, {transform_indices = @transform_3, window_bounds = array<i64: 16, 12>}, {transform_indices = @transform_4, window_bounds = array<i64: 16, 4>}, {transform_indices = @transform_5, window_bounds = array<i64: 16, 512>}, {transform_indices = @transform_6, window_bounds = array<i64: 16, 128>}, {transform_indices = @transform_7, window_bounds = array<i64: 16, 128>}]} {
    %c0_i32 = arith.constant 0 : i32
    %0 = arith.cmpi eq, %arg1, %c0_i32 : i32
    %1 = arith.extui %0 : i1 to i32
    %c0_i32_0 = arith.constant 0 : i32
    %2 = arith.cmpi ne, %1, %c0_i32_0 : i32
    scf.if %2 {
      %cst_9 = arith.constant 0.000000e+00 : f32
      %11 = vector.broadcast %cst_9 : f32 to vector<16x128xf32>
      %c0_10 = arith.constant 0 : index
      %c0_11 = arith.constant 0 : index
      %12 = vector.load %arg10[%c0_10, %c0_11] : memref<16x128xf32, #tpu.memory_space<vmem>>, vector<16x128xf32>
      tpu.vector_store %arg10[%c0_10, %c0_11], %11 {strides = array<i32>} : memref<16x128xf32, #tpu.memory_space<vmem>>, vector<16x128xf32>,
    } else {
    }
    %c0 = arith.constant 0 : index
    %c0_1 = arith.constant 0 : index
    %3 = vector.load %arg10[%c0, %c0_1] : memref<16x128xf32, #tpu.memory_space<vmem>>, vector<16x128xf32>
    %c0_2 = arith.constant 0 : index
    %c0_3 = arith.constant 0 : index
    %c0_4 = arith.constant 0 : index
    %4 = vector.load %arg2[%c0_2, %c0_3, %c0_4] : memref<16x8x128xf32, #tpu.memory_space<vmem>>, vector<16x8x128xf32>
    %cst = arith.constant dense<0.000000e+00> : vector<16x128xf32>
    %5 = vector.multi_reduction <add>, %4, %cst [1] : vector<16x8x128xf32> to vector<16x128xf32>
    %6 = arith.addf %3, %5 : vector<16x128xf32>
    %c0_5 = arith.constant 0 : index
    %c0_6 = arith.constant 0 : index
    %7 = vector.load %arg10[%c0_5, %c0_6] : memref<16x128xf32, #tpu.memory_space<vmem>>, vector<16x128xf32>
    tpu.vector_store %arg10[%c0_5, %c0_6], %6 {strides = array<i32>} : memref<16x128xf32, #tpu.memory_space<vmem>>, vector<16x128xf32>,
    %c0_i32_7 = arith.constant 0 : i32
    %8 = arith.cmpi eq, %arg1, %c0_i32_7 : i32
    %9 = arith.extui %8 : i1 to i32
    %c0_i32_8 = arith.constant 0 : i32
    %10 = arith.cmpi ne, %9, %c0_i32_8 : i32
    scf.if %10 {
      %c0_9 = arith.constant 0 : index
      %c0_10 = arith.constant 0 : index
      %11 = vector.load %arg10[%c0_9, %c0_10] : memref<16x128xf32, #tpu.memory_space<vmem>>, vector<16x128xf32>
      %c0_11 = arith.constant 0 : index
      %c0_12 = arith.constant 0 : index
      %12 = vector.load %arg3[%c0_11, %c0_12] : memref<128x128xf32, #tpu.memory_space<vmem>>, vector<128x128xf32>
      %cst_13 = arith.constant dense<0.000000e+00> : vector<16x128xf32>
      %13 = tpu.matmul %11, %12, %cst_13 {dimension_numbers = #tpu.dot_dimension_numbers<[1], [0], [0], [1], [0, 0, 1, 1], [], []>} : vector<16x128xf32>, vector<128x128xf32>, vector<16x128xf32> -> vector<16x128xf32>
      %cst_14 = arith.constant 3.125000e-02 : f32
      %14 = vector.broadcast %cst_14 : f32 to vector<16x128xf32>
      %15 = arith.mulf %13, %14 : vector<16x128xf32>
      %c0_15 = arith.constant 0 : index
      %c0_16 = arith.constant 0 : index
      %16 = vector.load %arg4[%c0_15, %c0_16] : memref<1x128xf32, #tpu.memory_space<vmem>>, vector<1x128xf32>
      %17 = vector.broadcast %16 : vector<1x128xf32> to vector<16x128xf32>
      %18 = arith.addf %15, %17 : vector<16x128xf32>
      %c0_17 = arith.constant 0 : index
      %c0_18 = arith.constant 0 : index
      %19 = vector.load %arg8[%c0_17, %c0_18] : memref<16x128xf32, #tpu.memory_space<vmem>>, vector<16x128xf32>
      tpu.vector_store %arg8[%c0_17, %c0_18], %18 {strides = array<i32>} : memref<16x128xf32, #tpu.memory_space<vmem>>, vector<16x128xf32>,
      %c0_19 = arith.constant 0 : index
      %c0_20 = arith.constant 0 : index
      %20 = vector.load %arg5[%c0_19, %c0_20] : memref<16x12xi32, #tpu.memory_space<vmem>>, vector<16x12xi32>
      %21 = tpu.iota {dimensions = array<i32: 1>} : vector<16x128xi32>
      %cst_21 = arith.constant 0.000000e+00 : f32
      %22 = vector.broadcast %cst_21 : f32 to vector<16x1xf32>
      %23 = vector.extract_strided_slice %20 {offsets = [0, 0], sizes = [16, 1], strides = [1, 1]} : vector<16x12xi32> to vector<16x1xi32>
      %24 = vector.shape_cast %23 : vector<16x1xi32> to vector<16xi32>
      %25 = vector.shape_cast %24 : vector<16xi32> to vector<16x1xi32>
      %26 = vector.broadcast %25 : vector<16x1xi32> to vector<16x128xi32>
      %27 = arith.cmpi eq, %21, %26 : vector<16x128xi32>
      %cst_22 = arith.constant 0.000000e+00 : f32
      %28 = vector.broadcast %cst_22 : f32 to vector<16x128xf32>
      %29 = arith.select %27, %18, %28 : vector<16x128xi1>, vector<16x128xf32>
      %cst_23 = arith.constant dense<0.000000e+00> : vector<16xf32>
      %30 = vector.multi_reduction <add>, %29, %cst_23 [1] : vector<16x128xf32> to vector<16xf32>
      %31 = vector.shape_cast %30 : vector<16xf32> to vector<16x1xf32>
      %32 = arith.addf %22, %31 : vector<16x1xf32>
      %33 = vector.extract_strided_slice %20 {offsets = [0, 1], sizes = [16, 1], strides = [1, 1]} : vector<16x12xi32> to vector<16x1xi32>
      %34 = vector.shape_cast %33 : vector<16x1xi32> to vector<16xi32>
      %35 = vector.shape_cast %34 : vector<16xi32> to vector<16x1xi32>
      %36 = vector.broadcast %35 : vector<16x1xi32> to vector<16x128xi32>
      %37 = arith.cmpi eq, %21, %36 : vector<16x128xi32>
      %cst_24 = arith.constant 0.000000e+00 : f32
      %38 = vector.broadcast %cst_24 : f32 to vector<16x128xf32>
      %39 = arith.select %37, %18, %38 : vector<16x128xi1>, vector<16x128xf32>
      %cst_25 = arith.constant dense<0.000000e+00> : vector<16xf32>
      %40 = vector.multi_reduction <add>, %39, %cst_25 [1] : vector<16x128xf32> to vector<16xf32>
      %41 = vector.shape_cast %40 : vector<16xf32> to vector<16x1xf32>
      %42 = arith.addf %32, %41 : vector<16x1xf32>
      %43 = vector.extract_strided_slice %20 {offsets = [0, 2], sizes = [16, 1], strides = [1, 1]} : vector<16x12xi32> to vector<16x1xi32>
      %44 = vector.shape_cast %43 : vector<16x1xi32> to vector<16xi32>
      %45 = vector.shape_cast %44 : vector<16xi32> to vector<16x1xi32>
      %46 = vector.broadcast %45 : vector<16x1xi32> to vector<16x128xi32>
      %47 = arith.cmpi eq, %21, %46 : vector<16x128xi32>
      %cst_26 = arith.constant 0.000000e+00 : f32
      %48 = vector.broadcast %cst_26 : f32 to vector<16x128xf32>
      %49 = arith.select %47, %18, %48 : vector<16x128xi1>, vector<16x128xf32>
      %cst_27 = arith.constant dense<0.000000e+00> : vector<16xf32>
      %50 = vector.multi_reduction <add>, %49, %cst_27 [1] : vector<16x128xf32> to vector<16xf32>
      %51 = vector.shape_cast %50 : vector<16xf32> to vector<16x1xf32>
      %52 = arith.addf %42, %51 : vector<16x1xf32>
      %cst_28 = arith.constant 0.000000e+00 : f32
      %53 = vector.broadcast %cst_28 : f32 to vector<16x1xf32>
      %54 = vector.extract_strided_slice %20 {offsets = [0, 3], sizes = [16, 1], strides = [1, 1]} : vector<16x12xi32> to vector<16x1xi32>
      %55 = vector.shape_cast %54 : vector<16x1xi32> to vector<16xi32>
      %56 = vector.shape_cast %55 : vector<16xi32> to vector<16x1xi32>
      %57 = vector.broadcast %56 : vector<16x1xi32> to vector<16x128xi32>
      %58 = arith.cmpi eq, %21, %57 : vector<16x128xi32>
      %cst_29 = arith.constant 0.000000e+00 : f32
      %59 = vector.broadcast %cst_29 : f32 to vector<16x128xf32>
      %60 = arith.select %58, %18, %59 : vector<16x128xi1>, vector<16x128xf32>
      %cst_30 = arith.constant dense<0.000000e+00> : vector<16xf32>
      %61 = vector.multi_reduction <add>, %60, %cst_30 [1] : vector<16x128xf32> to vector<16xf32>
      %62 = vector.shape_cast %61 : vector<16xf32> to vector<16x1xf32>
      %63 = arith.addf %53, %62 : vector<16x1xf32>
      %64 = vector.extract_strided_slice %20 {offsets = [0, 4], sizes = [16, 1], strides = [1, 1]} : vector<16x12xi32> to vector<16x1xi32>
      %65 = vector.shape_cast %64 : vector<16x1xi32> to vector<16xi32>
      %66 = vector.shape_cast %65 : vector<16xi32> to vector<16x1xi32>
      %67 = vector.broadcast %66 : vector<16x1xi32> to vector<16x128xi32>
      %68 = arith.cmpi eq, %21, %67 : vector<16x128xi32>
      %cst_31 = arith.constant 0.000000e+00 : f32
      %69 = vector.broadcast %cst_31 : f32 to vector<16x128xf32>
      %70 = arith.select %68, %18, %69 : vector<16x128xi1>, vector<16x128xf32>
      %cst_32 = arith.constant dense<0.000000e+00> : vector<16xf32>
      %71 = vector.multi_reduction <add>, %70, %cst_32 [1] : vector<16x128xf32> to vector<16xf32>
      %72 = vector.shape_cast %71 : vector<16xf32> to vector<16x1xf32>
      %73 = arith.addf %63, %72 : vector<16x1xf32>
      %74 = vector.extract_strided_slice %20 {offsets = [0, 5], sizes = [16, 1], strides = [1, 1]} : vector<16x12xi32> to vector<16x1xi32>
      %75 = vector.shape_cast %74 : vector<16x1xi32> to vector<16xi32>
      %76 = vector.shape_cast %75 : vector<16xi32> to vector<16x1xi32>
      %77 = vector.broadcast %76 : vector<16x1xi32> to vector<16x128xi32>
      %78 = arith.cmpi eq, %21, %77 : vector<16x128xi32>
      %cst_33 = arith.constant 0.000000e+00 : f32
      %79 = vector.broadcast %cst_33 : f32 to vector<16x128xf32>
      %80 = arith.select %78, %18, %79 : vector<16x128xi1>, vector<16x128xf32>
      %cst_34 = arith.constant dense<0.000000e+00> : vector<16xf32>
      %81 = vector.multi_reduction <add>, %80, %cst_34 [1] : vector<16x128xf32> to vector<16xf32>
      %82 = vector.shape_cast %81 : vector<16xf32> to vector<16x1xf32>
      %83 = arith.addf %73, %82 : vector<16x1xf32>
      %cst_35 = arith.constant 0.000000e+00 : f32
      %84 = vector.broadcast %cst_35 : f32 to vector<16x1xf32>
      %85 = vector.extract_strided_slice %20 {offsets = [0, 6], sizes = [16, 1], strides = [1, 1]} : vector<16x12xi32> to vector<16x1xi32>
      %86 = vector.shape_cast %85 : vector<16x1xi32> to vector<16xi32>
      %87 = vector.shape_cast %86 : vector<16xi32> to vector<16x1xi32>
      %88 = vector.broadcast %87 : vector<16x1xi32> to vector<16x128xi32>
      %89 = arith.cmpi eq, %21, %88 : vector<16x128xi32>
      %cst_36 = arith.constant 0.000000e+00 : f32
      %90 = vector.broadcast %cst_36 : f32 to vector<16x128xf32>
      %91 = arith.select %89, %18, %90 : vector<16x128xi1>, vector<16x128xf32>
      %cst_37 = arith.constant dense<0.000000e+00> : vector<16xf32>
      %92 = vector.multi_reduction <add>, %91, %cst_37 [1] : vector<16x128xf32> to vector<16xf32>
      %93 = vector.shape_cast %92 : vector<16xf32> to vector<16x1xf32>
      %94 = arith.addf %84, %93 : vector<16x1xf32>
      %95 = vector.extract_strided_slice %20 {offsets = [0, 7], sizes = [16, 1], strides = [1, 1]} : vector<16x12xi32> to vector<16x1xi32>
      %96 = vector.shape_cast %95 : vector<16x1xi32> to vector<16xi32>
      %97 = vector.shape_cast %96 : vector<16xi32> to vector<16x1xi32>
      %98 = vector.broadcast %97 : vector<16x1xi32> to vector<16x128xi32>
      %99 = arith.cmpi eq, %21, %98 : vector<16x128xi32>
      %cst_38 = arith.constant 0.000000e+00 : f32
      %100 = vector.broadcast %cst_38 : f32 to vector<16x128xf32>
      %101 = arith.select %99, %18, %100 : vector<16x128xi1>, vector<16x128xf32>
      %cst_39 = arith.constant dense<0.000000e+00> : vector<16xf32>
      %102 = vector.multi_reduction <add>, %101, %cst_39 [1] : vector<16x128xf32> to vector<16xf32>
      %103 = vector.shape_cast %102 : vector<16xf32> to vector<16x1xf32>
      %104 = arith.addf %94, %103 : vector<16x1xf32>
      %105 = vector.extract_strided_slice %20 {offsets = [0, 8], sizes = [16, 1], strides = [1, 1]} : vector<16x12xi32> to vector<16x1xi32>
      %106 = vector.shape_cast %105 : vector<16x1xi32> to vector<16xi32>
      %107 = vector.shape_cast %106 : vector<16xi32> to vector<16x1xi32>
      %108 = vector.broadcast %107 : vector<16x1xi32> to vector<16x128xi32>
      %109 = arith.cmpi eq, %21, %108 : vector<16x128xi32>
      %cst_40 = arith.constant 0.000000e+00 : f32
      %110 = vector.broadcast %cst_40 : f32 to vector<16x128xf32>
      %111 = arith.select %109, %18, %110 : vector<16x128xi1>, vector<16x128xf32>
      %cst_41 = arith.constant dense<0.000000e+00> : vector<16xf32>
      %112 = vector.multi_reduction <add>, %111, %cst_41 [1] : vector<16x128xf32> to vector<16xf32>
      %113 = vector.shape_cast %112 : vector<16xf32> to vector<16x1xf32>
      %114 = arith.addf %104, %113 : vector<16x1xf32>
      %cst_42 = arith.constant 0.000000e+00 : f32
      %115 = vector.broadcast %cst_42 : f32 to vector<16x1xf32>
      %116 = vector.extract_strided_slice %20 {offsets = [0, 9], sizes = [16, 1], strides = [1, 1]} : vector<16x12xi32> to vector<16x1xi32>
      %117 = vector.shape_cast %116 : vector<16x1xi32> to vector<16xi32>
      %118 = vector.shape_cast %117 : vector<16xi32> to vector<16x1xi32>
      %119 = vector.broadcast %118 : vector<16x1xi32> to vector<16x128xi32>
      %120 = arith.cmpi eq, %21, %119 : vector<16x128xi32>
      %cst_43 = arith.constant 0.000000e+00 : f32
      %121 = vector.broadcast %cst_43 : f32 to vector<16x128xf32>
      %122 = arith.select %120, %18, %121 : vector<16x128xi1>, vector<16x128xf32>
      %cst_44 = arith.constant dense<0.000000e+00> : vector<16xf32>
      %123 = vector.multi_reduction <add>, %122, %cst_44 [1] : vector<16x128xf32> to vector<16xf32>
      %124 = vector.shape_cast %123 : vector<16xf32> to vector<16x1xf32>
      %125 = arith.addf %115, %124 : vector<16x1xf32>
      %126 = vector.extract_strided_slice %20 {offsets = [0, 10], sizes = [16, 1], strides = [1, 1]} : vector<16x12xi32> to vector<16x1xi32>
      %127 = vector.shape_cast %126 : vector<16x1xi32> to vector<16xi32>
      %128 = vector.shape_cast %127 : vector<16xi32> to vector<16x1xi32>
      %129 = vector.broadcast %128 : vector<16x1xi32> to vector<16x128xi32>
      %130 = arith.cmpi eq, %21, %129 : vector<16x128xi32>
      %cst_45 = arith.constant 0.000000e+00 : f32
      %131 = vector.broadcast %cst_45 : f32 to vector<16x128xf32>
      %132 = arith.select %130, %18, %131 : vector<16x128xi1>, vector<16x128xf32>
      %cst_46 = arith.constant dense<0.000000e+00> : vector<16xf32>
      %133 = vector.multi_reduction <add>, %132, %cst_46 [1] : vector<16x128xf32> to vector<16xf32>
      %134 = vector.shape_cast %133 : vector<16xf32> to vector<16x1xf32>
      %135 = arith.addf %125, %134 : vector<16x1xf32>
      %136 = vector.extract_strided_slice %20 {offsets = [0, 11], sizes = [16, 1], strides = [1, 1]} : vector<16x12xi32> to vector<16x1xi32>
      %137 = vector.shape_cast %136 : vector<16x1xi32> to vector<16xi32>
      %138 = vector.shape_cast %137 : vector<16xi32> to vector<16x1xi32>
      %139 = vector.broadcast %138 : vector<16x1xi32> to vector<16x128xi32>
      %140 = arith.cmpi eq, %21, %139 : vector<16x128xi32>
      %cst_47 = arith.constant 0.000000e+00 : f32
      %141 = vector.broadcast %cst_47 : f32 to vector<16x128xf32>
      %142 = arith.select %140, %18, %141 : vector<16x128xi1>, vector<16x128xf32>
      %cst_48 = arith.constant dense<0.000000e+00> : vector<16xf32>
      %143 = vector.multi_reduction <add>, %142, %cst_48 [1] : vector<16x128xf32> to vector<16xf32>
      %144 = vector.shape_cast %143 : vector<16xf32> to vector<16x1xf32>
      %145 = arith.addf %135, %144 : vector<16x1xf32>
      %146 = tpu.concatenate %52, %83, %114, %145 in 1 : vector<16x1xf32>, vector<16x1xf32>, vector<16x1xf32>, vector<16x1xf32> -> vector<16x4xf32>
      %c0_49 = arith.constant 0 : index
      %c0_50 = arith.constant 0 : index
      %147 = vector.load %arg6[%c0_49, %c0_50] : memref<16x4xf32, #tpu.memory_space<vmem>>, vector<16x4xf32>
      %148 = arith.addf %146, %147 : vector<16x4xf32>
      %cst_51 = arith.constant dense<0xFF800000> : vector<16xf32>
      %149 = vector.multi_reduction <maximumf>, %148, %cst_51 [1] : vector<16x4xf32> to vector<16xf32>
      %150 = vector.shape_cast %149 : vector<16xf32> to vector<16x1xf32>
      %151 = vector.broadcast %150 : vector<16x1xf32> to vector<16x4xf32>
      %152 = arith.subf %148, %151 : vector<16x4xf32>
      %153 = math.exp %152 : vector<16x4xf32>
      %cst_52 = arith.constant dense<0.000000e+00> : vector<16xf32>
      %154 = vector.multi_reduction <add>, %153, %cst_52 [1] : vector<16x4xf32> to vector<16xf32>
      %155 = vector.shape_cast %154 : vector<16xf32> to vector<16x1xf32>
      %156 = vector.broadcast %155 : vector<16x1xf32> to vector<16x4xf32>
      %157 = arith.divf %153, %156 : vector<16x4xf32>
      %cst_53 = arith.constant 0.000000e+00 : f32
      %158 = vector.broadcast %cst_53 : f32 to vector<16x128xf32>
      %159 = vector.extract_strided_slice %157 {offsets = [0, 0], sizes = [16, 1], strides = [1, 1]} : vector<16x4xf32> to vector<16x1xf32>
      %c0_54 = arith.constant 0 : index
      %c0_55 = arith.constant 0 : index
      %160 = vector.load %arg7[%c0_54, %c0_55] : memref<16x512xbf16, #tpu.memory_space<vmem>>, vector<16x128xbf16>
      %161 = arith.extf %160 : vector<16x128xbf16> to vector<16x128xf32>
      %162 = vector.broadcast %159 : vector<16x1xf32> to vector<16x128xf32>
      %163 = arith.mulf %162, %161 : vector<16x128xf32>
      %164 = arith.addf %158, %163 : vector<16x128xf32>
      %165 = vector.extract_strided_slice %157 {offsets = [0, 1], sizes = [16, 1], strides = [1, 1]} : vector<16x4xf32> to vector<16x1xf32>
      %c0_56 = arith.constant 0 : index
      %c128 = arith.constant 128 : index
      %166 = vector.load %arg7[%c0_56, %c128] : memref<16x512xbf16, #tpu.memory_space<vmem>>, vector<16x128xbf16>
      %167 = arith.extf %166 : vector<16x128xbf16> to vector<16x128xf32>
      %168 = vector.broadcast %165 : vector<16x1xf32> to vector<16x128xf32>
      %169 = arith.mulf %168, %167 : vector<16x128xf32>
      %170 = arith.addf %164, %169 : vector<16x128xf32>
      %171 = vector.extract_strided_slice %157 {offsets = [0, 2], sizes = [16, 1], strides = [1, 1]} : vector<16x4xf32> to vector<16x1xf32>
      %c0_57 = arith.constant 0 : index
      %c256 = arith.constant 256 : index
      %172 = vector.load %arg7[%c0_57, %c256] : memref<16x512xbf16, #tpu.memory_space<vmem>>, vector<16x128xbf16>
      %173 = arith.extf %172 : vector<16x128xbf16> to vector<16x128xf32>
      %174 = vector.broadcast %171 : vector<16x1xf32> to vector<16x128xf32>
      %175 = arith.mulf %174, %173 : vector<16x128xf32>
      %176 = arith.addf %170, %175 : vector<16x128xf32>
      %177 = vector.extract_strided_slice %157 {offsets = [0, 3], sizes = [16, 1], strides = [1, 1]} : vector<16x4xf32> to vector<16x1xf32>
      %c0_58 = arith.constant 0 : index
      %c384 = arith.constant 384 : index
      %178 = vector.load %arg7[%c0_58, %c384] : memref<16x512xbf16, #tpu.memory_space<vmem>>, vector<16x128xbf16>
      %179 = arith.extf %178 : vector<16x128xbf16> to vector<16x128xf32>
      %180 = vector.broadcast %177 : vector<16x1xf32> to vector<16x128xf32>
      %181 = arith.mulf %180, %179 : vector<16x128xf32>
      %182 = arith.addf %176, %181 : vector<16x128xf32>
      %c0_59 = arith.constant 0 : index
      %c0_60 = arith.constant 0 : index
      %183 = vector.load %arg9[%c0_59, %c0_60] : memref<16x128xf32, #tpu.memory_space<vmem>>, vector<16x128xf32>
      tpu.vector_store %arg9[%c0_59, %c0_60], %182 {strides = array<i32>} : memref<16x128xf32, #tpu.memory_space<vmem>>, vector<16x128xf32>,
    } else {
    }
    return
  }
  func.func @transform_0(%arg0: i32, %arg1: i32) -> (i32, i32, i32) {
    %c0_i32 = arith.constant 0 : i32
    %c0_i32_0 = arith.constant 0 : i32
    return %arg0, %arg1, %c0_i32 : i32, i32, i32
  }
  func.func @transform_1(%arg0: i32, %arg1: i32) -> (i32, i32) {
    %c0_i32 = arith.constant 0 : i32
    %c0_i32_0 = arith.constant 0 : i32
    %c0_i32_1 = arith.constant 0 : i32
    return %c0_i32, %c0_i32_0 : i32, i32
  }
  func.func @transform_2(%arg0: i32, %arg1: i32) -> (i32, i32) {
    %c0_i32 = arith.constant 0 : i32
    %c0_i32_0 = arith.constant 0 : i32
    %c0_i32_1 = arith.constant 0 : i32
    return %c0_i32, %c0_i32_0 : i32, i32
  }
  func.func @transform_3(%arg0: i32, %arg1: i32) -> (i32, i32) {
    %c0_i32 = arith.constant 0 : i32
    %c0_i32_0 = arith.constant 0 : i32
    return %arg0, %c0_i32 : i32, i32
  }
  func.func @transform_4(%arg0: i32, %arg1: i32) -> (i32, i32) {
    %c0_i32 = arith.constant 0 : i32
    %c0_i32_0 = arith.constant 0 : i32
    return %arg0, %c0_i32 : i32, i32
  }
  func.func @transform_5(%arg0: i32, %arg1: i32) -> (i32, i32) {
    %c0_i32 = arith.constant 0 : i32
    %c0_i32_0 = arith.constant 0 : i32
    return %arg0, %c0_i32 : i32, i32
  }
  func.func @transform_6(%arg0: i32, %arg1: i32) -> (i32, i32) {
    %c0_i32 = arith.constant 0 : i32
    %c0_i32_0 = arith.constant 0 : i32
    return %arg0, %c0_i32 : i32, i32
  }
  func.func @transform_7(%arg0: i32, %arg1: i32) -> (i32, i32) {
    %c0_i32 = arith.constant 0 : i32
    %c0_i32_0 = arith.constant 0 : i32
    return %arg0, %c0_i32 : i32, i32
  }
}

</mosaic_0001>

<bundles_post_ra>
// kernel: tpu_custom_call.1
= control target key start
LH: loop header
LB: loop body
LE: loop exit
PB: predicated region body
PF: predicated region fallthrough
CT: control target
= control target key end

     0   :  { %s2129_s0 = inlined_call_operand.hbm [shape: f32[32,8,128], index: 0, kind: input, shape index: {}]   ;;  %s2130_s1 = inlined_call_operand.hbm [shape: f32[128,128], index: 1, kind: input, shape index: {}]   ;;  %s2131_s2 = inlined_call_operand.vmem [shape: f32[1,128], index: 2, kind: input, shape index: {}]   ;;  %s2132_s3 = inlined_call_operand.vmem [shape: s32[32,12], index: 3, kind: input, shape index: {}]   ;;  %s2133_s4 = inlined_call_operand.vmem [shape: f32[32,4], index: 4, kind: input, shape index: {}]   ;;  %s2134_s5 = inlined_call_operand.vmem [shape: bf16[32,512], index: 5, kind: input, shape index: {}]   ;;  %s2135_s6 = inlined_call_operand.hbm [shape: f32[32,128], index: 6, kind: output, shape index: {0}]   ;;  %s2136_s7 = inlined_call_operand.hbm [shape: f32[32,128], index: 7, kind: output, shape index: {1}]  }
   0x1   :  { %2144 = sst [smem:[#allocation15_spill]] %s2130_s1 }
   0x2   :  { %13 = vsyncpa [#allocation4], 0 }
   0x3   :  { %15 = vsyncpa [#allocation4 + $0x1], 0 }
   0x4   :  { %16 = vsyncpa [#allocation7], 0 }
   0x5   :  { %17 = vsyncpa [#allocation5], 0 }
   0x6   :  { %19 = vsyncpa [#allocation5 + $0x1], 0 }
   0x7   :  { %20 = vsyncpa [#allocation10], 0 }
   0x8   :  { %22 = vsyncpa [#allocation10 + $0x1], 0  ;;  %s1660_s24 = smov 0   ;;  %s1662_s25 = smov 0  }
   0x9   :  { %s1664_s26 = smov 0   ;;  %s1666_s27 = smov 0  }
   0xa   :  { %s1668_s28 = smov 0   ;;  %s1670_s29 = smov 0  }
   0xb LB: > { %s1178_s30 = sadd.s32 4294967295, %s1598_s29   ;;  %s1179_s8 = sadd.s32 4294967294, %s1598_s29   ;;  %s1598_s29 = sphi %s1670_s29, %s28_s29   ;;  %s1594_s28 = sphi %s1668_s28, %s2168_s28   ;;  %s1590_s27 = sphi %s1666_s27, %s2167_s27   ;;  %s1586_s26 = sphi %s1664_s26, %s2166_s26   ;;  %s1582_s25 = sphi %s1662_s25, %s2165_s25   ;;  %s1578_s24 = sphi %s1660_s24, %s2164_s24  }
   0xc   : > { %p62_p0 = scmp.ne.s32.totalorder %s1582_s25, %s1578_s24  ;;  %p1694_p1 = scmp.eq.s32.totalorder %s1178_s30, 0 }
   0xd   : > { %p1698_p2 = scmp.eq.s32.totalorder %s1178_s30, 1  ;;  %p212_p3 = scmp.eq.s32.totalorder %s1179_s8, 1 }
   0xe   : > { %s2145_s9 = scalar_select %p1694_p1, 1, 0 }
   0xf   : > { %s2146_s10 = scalar_select %p1698_p2, 1, 0 }
  0x10   : > { %p1704_p4 = por %p1694_p1, %p62_p0  ;;  %p1180_p5 = scmp.ge.s32.totalorder %s1598_s29, 1 }
  0x11   : > { %p1709_p6 = por %p212_p3, %p62_p0  ;;  %p245_p7 = scmp.lt.s32.totalorder %s1598_s29, 3 }
  0x12   : > { %s2147_s11 = scalar_select %p1704_p4, 1, 0 }
  0x13   : > { %s2148_s12 = scalar_select %p1709_p6, 1, 0 }
  0x14   : > { %p1714_p8 = pnand %p1180_p5, %p245_p7  ;;  %s1600_s14 = smov [#allocation6]  }
  0x15   : > { %s257_s15 = sshll.u32 %s1600_s14, 4  ;;  %s40_s17 = sadd.s32 1, %s1594_s28  ;;  %s258_s15 = int_to_ptr.vmem [resolvable:$true] %s257_s15 }
  0x16   : > { %s2149_s13 = scalar_select %p1714_p8, 1, 0 }
  0x17   : > { %p1306_p9 = pneg %p1714_p8  ;;  %s2151_s1 = sld [smem:[#allocation15_spill]] }
  0x19   : > { %p1723_p11 = pnand %p1306_p9, %p1694_p1 }
  0x1b   : > { %p1424_p13 = pneg %p1723_p11 }
  0x1d   : > { %s1422_s20 = scalar_lea.hbm %s2151_s1, 2048 }
  0x1e   : > { %p1423_p12 = scmp.ne.s32.totalorder %s2151_s1, %s1422_s20  ;;  %p1429_p5 = scmp.lt.u32.totalorder %s1422_s20, %s2151_s1 }
  0x20   : > { %p1425_p0 = pnand %p1424_p13, %p1423_p12 }
  0x22   : > { %p1426_p3 = pneg %p1425_p0 }
  0x24   : > { %p1431_p7 = pnand %p1429_p5, %p1426_p3 }
  0x26   : > { %1434 = shalt.err (!%p1431_p7)
}
  0x27   : > { %s1435_s8 = scalar_lea.vmem %s258_s15, 2048  ;;  %p1443_p1 = scmp.lt.s32.totalorder %s258_s15, %s258_s15 }
  0x28   : > { %p1436_p9 = scmp.ne.s32.totalorder %s258_s15, %s1435_s8  ;;  %p1444_p4 = scmp.lt.s32.totalorder %s1435_s8, %s1435_s8 }
  0x2a   : > { %p1438_p10 = pnand %p1436_p9, %p1424_p13  ;;  %p1445_p8 = por %p1444_p4, %p1443_p1 }
  0x2c   : > { %p1439_p6 = pneg %p1438_p10 }
  0x2e   : > { %p1446_p2 = pnand %p1445_p8, %p1439_p6 }
  0x30   : > { %1449 = shalt.err (!%p1446_p2)
}
  0x31   : > { %s2141_s14 = smov 128   ;;  %s2142_s18 = smov 8  }
  0x32   : > { %1309 = dma.hbm_to_vmem [thread:$0]  (!%p1723_p11), %s2151_s1, 2048, %s258_s15, [#allocation7], %s2141_s14, %s2141_s14, %s2142_s18  }
  0x33   : > { %p42_p1 = scmp.ge.s32.totalorder %s40_s17, 2  ;;  %s49_s21 = sadd.s32 1, %s1586_s26 }
  0x34   : > { %p56_p2 = scmp.ne.s32.totalorder %s1586_s26, %s1582_s25  ;;  %p57_p4 = scmp.eq.s32.totalorder %s1598_s29, 0 }
  0x35   : > { %s2170_s17 = smov (%p42_p1, %s40_s17), 0  ;;  %p2153_p8 = scmp.ne.s32.totalorder %s2146_s10, 0 }
  0x36   : > { %p1753_p6 = por %p57_p4, %p56_p2  ;;  %s44_s23 = ssub.s32 %s1594_s28, %s2170_s17 }
  0x37   : > { %p1759_p10 = por %p2153_p8, %p56_p2  ;;  %p1322_p12 = scmp.lt.s32.totalorder %s1598_s29, 2 }
  0x38   : > { %p47_p11 = scmp.eq.s32.totalorder %s44_s23, 0  ;;  %s274_s15 = sand.u32 1, %s1586_s26  }
  0x39   : > { %s1183_s30 = sshll.u32 %s274_s15, 7  ;;  %s1207_s19 = sshll.u32 %s1594_s28, 11 }
  0x3a   : > { %s1768_s8 = scalar_select %p47_p11, %s1586_s26, %s49_s21  }
  0x3b   : > { %s1774_s18 = scalar_lea.hbm %s2129_s0, %s1207_s19  ;;  %s278_s10 = scalar_lea.vmem [#allocation3], %s1183_s30 }
  0x3c   : > { %s286_s1 = sshll.u32 %s278_s10, 4  ;;  %p1780_p13 = pnand %p1322_p12, %p1753_p6  ;;  %s1776_s1 = int_to_ptr.vmem [resolvable:$true] %s286_s1 }
  0x3d   : > { %s1784_s21 = scalar_lea.sflag [#allocation4], %s274_s15  ;;  %s1450_s14 = scalar_lea.hbm %s1774_s18, 2048 }
  0x3e   : > { %p1451_p0 = scmp.ne.s32.totalorder %s1774_s18, %s1450_s14  ;;  %p1452_p3 = pneg %p1780_p13 }
  0x3f   : > { %s1455_s22 = scalar_lea.hbm %s2129_s0, 4096  ;;  %p1456_p9 = scmp.lt.u32.totalorder %s1774_s18, %s2129_s0 }
  0x40   : > { %p1453_p5 = pnand %p1452_p3, %p1451_p0  ;;  %p1457_p1 = scmp.lt.u32.totalorder %s1455_s22, %s1450_s14 }
  0x41   : > { %p1459_p4 = scmp.lt.u32.totalorder %s1450_s14, %s1774_s18 }
  0x42   : > { %p1454_p7 = pneg %p1453_p5  ;;  %p1458_p2 = por %p1457_p1, %p1456_p9 }
  0x44   : > { %p1460_p6 = por %p1459_p4, %p1458_p2 }
  0x46   : > { %p1461_p8 = pnand %p1460_p6, %p1454_p7 }
  0x48   : > { %1464 = shalt.err (!%p1461_p8)
}
  0x49   : > { %s1465_s15 = scalar_lea.vmem %s1776_s1, 2048  ;;  %s1603_s30 = smov [#allocation3]  }
  0x4a   : > { %p1466_p12 = scmp.ne.s32.totalorder %s1776_s1, %s1465_s15  ;;  %s1470_s19 = sshll.u32 %s1603_s30, 4  ;;  %s1471_s19 = int_to_ptr.vmem [resolvable:$false] %s1470_s19 }
  0x4b   : > { %s1472_s20 = scalar_lea.vmem %s1471_s19, 4096  ;;  %p1473_p5 = scmp.lt.s32.totalorder %s1776_s1, %s1471_s19 }
  0x4c   : > { %p1468_p11 = pnand %p1466_p12, %p1452_p3  ;;  %p1474_p9 = scmp.lt.s32.totalorder %s1472_s20, %s1465_s15 }
  0x4e   : > { %p1469_p0 = pneg %p1468_p11  ;;  %p1475_p1 = por %p1474_p9, %p1473_p5 }
  0x50   : > { %p1476_p2 = pnand %p1475_p1, %p1469_p0 }
  0x52   : > { %1479 = shalt.err (!%p1476_p2)
}
  0x53   : > { %s2156_s14 = smov 8   ;;  %s2157_s22 = smov 128  }
  0x54   : > { %1313 = dma.hbm_to_vmem [thread:$0]  (!%p1780_p13), %s1774_s18, 2048, %s1776_s1, %s1784_s21, %s2157_s22, %s2157_s22, %s2156_s14  }
  0x55   : > { %p2158_p3 = scmp.ne.s32.totalorder %s2149_s13, 0 }
  0x56   : > { %s1818_s10 = sand.u32 (!%p2158_p3), 1, %s1582_s25   ;;  %p2159_p7 = scmp.ne.s32.totalorder (!%p2158_p3), %s2147_s11, 0 }
  0x57   : > { %326 = sbr.rel (%p2158_p3) target bundleno = 1036 (0x40c), region = 44  ;;  %s1187_s15 = sshll.u32 (!%p2158_p3), %s1818_s10, 7 }
  0x58   : > { %s329_s30 = scalar_lea.sflag (!%p2158_p3), [#allocation4], %s1818_s10  ;;  %s1822_s19 = scalar_lea.vmem (!%p2158_p3), [#allocation3], %s1187_s15 }
  0x5e   : > { %1561 = dma.done.wait (%p2159_p7), %s329_s30, 2048  }
  0x5f   : > { %1563 = vsyncadd (%p2159_p7), %s329_s30, 4294965248  ;;  %p2160_p13 = scmp.ne.s32.totalorder %s2145_s9, 0 }
  0x61   : > { %1565 = dma.done.wait (%p2160_p13), [#allocation7], 2048  }
  0x62   : > { %1567 = vsyncadd (%p2160_p13), [#allocation7], 4294965248  ;;  %s1191_s1 = sshll.u32 %s1590_s27, 1  ;;  %v1604_v0 = vmov 1   ;;  %v1605_v1 = vmov 0   ;;  %v578_v2 = vld [vmem:[#allocation6] sm:$0xff] }
  0x63   : > { %1392 = vset.pattern.permute.xlu1 %v1604_v0  ;;  %p390_p4 = scmp.lt.s32.totalorder %s1191_s1, 3  ;;  %1390 = vset.pattern.permute.xlu0 %v1605_v1  ;;  %v579_v3 = vld [vmem:[#allocation6 + $0x8] sm:$0xff]  ;;  %v580_v4 = vld [vmem:[#allocation6 + $0x10] sm:$0xff]  ;;  %v581_v6 = vld [vmem:[#allocation6 + $0x18] sm:$0xff]  ;;  %vm546_vm0 = vcmask 1041409   ;;  %vm548_vm1 = vcmask 1042434  }
  0x64   : > { %v1264_v5 = vpack.c.bf16 %v579_v3, %v578_v2  ;;  %v582_v7 = vld [vmem:[#allocation6 + $0x20] sm:$0xff]  ;;  %v583_v8 = vld [vmem:[#allocation6 + $0x28] sm:$0xff]  ;;  %v1268_v9 = vpack.c.bf16 %v581_v6, %v580_v4  ;;  %v584_v10 = vld [vmem:[#allocation6 + $0x30] sm:$0xff]  ;;  %vm550_vm2 = vcmask 1043459   ;;  %vm552_vm3 = vcmask 1044484   ;;  %s1189_s23 = sshll.u32 %s1818_s10, 4 }
  0x65   : > { %s2172_s1 = smov (!%p390_p4, %s1191_s1), 3  ;;  %v585_v11 = vld [vmem:[#allocation6 + $0x38] sm:$0xff]  ;;  %v586_v12 = vld [vmem:[#allocation6 + $0x40] sm:$0xff]  ;;  %v587_v13 = vld [vmem:[#allocation6 + $0x48] sm:$0xff]  ;;  %v1272_v19 = vpack.c.bf16 %v583_v8, %v582_v7  ;;  %vm554_vm4 = vcmask 1045509   ;;  %vm556_vm5 = vcmask 1046534  }
  0x66   : > { %1265 = vmatprep.subr.bf16.mxu0 %v1264_v5  ;;  %v588_v14 = vld [vmem:[#allocation6 + $0x50] sm:$0xff]  ;;  %v589_v15 = vld [vmem:[#allocation6 + $0x58] sm:$0xff]  ;;  %v590_v16 = vld [vmem:[#allocation6 + $0x60] sm:$0xff]  ;;  %s1192_s9 = sshll.u32 %s2172_s1, 3  ;;  %v1838_v20 = vpack.c.bf16 %v585_v11, %v584_v10  ;;  %v1840_v21 = vpack.c.bf16 %v587_v13, %v586_v12  ;;  %vm558_vm6 = vcmask 1047559   ;;  %v1606_v12 = vmov 2  }
  0x67   : > { %1267 = vmatpush3.bf16.msra.mxu0 %v1264_v5  ;;  %v591_v17 = vld [vmem:[#allocation6 + $0x68] sm:$0xff]  ;;  %v592_v18 = vld [vmem:[#allocation6 + $0x70] sm:$0xff]  ;;  %v593_v22 = vld [vmem:[#allocation6 + $0x78] sm:$0xff]  ;;  %v1844_v25 = vpack.c.bf16 %v589_v15, %v588_v14  ;;  %s393_s18 = scalar_lea.vmem %s2132_s3, %s1192_s9  ;;  %s1954_s14 = scalar_lea.vmem [#allocation8], %s1189_s23 }
  0x68   : > { %1269 = vmatprep.subr.bf16.mxu0 %v1268_v9  ;;  %v418_v23 = vld [vmem:[%s1822_s19] sm:$0xff]  ;;  %v419_v24 = vld [vmem:[%s1822_s19 + $0x8] sm:$0xff]  ;;  %v1846_v26 = vpack.c.bf16 %v591_v17, %v590_v16  ;;  %v420_v27 = vld [vmem:[%s1822_s19 + $0x10] sm:$0xff]  ;;  %v1851_v32 = vpack.c.bf16 %v593_v22, %v592_v18  ;;  %s399_s30 = scalar_lea.vmem %s2133_s4, %s1192_s9  ;;  %s2143_s9 = sshll.u32 %s1590_s27, 8 }
  0x69   : > { %v421_v28 = vld [vmem:[%s1822_s19 + $0x18] sm:$0xff]  ;;  %v422_v29 = vld [vmem:[%s1822_s19 + $0x20] sm:$0xff]  ;;  %v434_v30 = vrot.slane %v418_v23, 4  ;;  %v440_v31 = vrot.slane %v419_v24, 4  ;;  %v423_v33 = vld [vmem:[%s1822_s19 + $0x28] sm:$0xff]  ;;  %v446_v36 = vrot.slane %v420_v27, 4 }
  0x6a   : > { %v424_v34 = vld [vmem:[%s1822_s19 + $0x30] sm:$0xff]  ;;  %v425_v35 = vld [vmem:[%s1822_s19 + $0x38] sm:$0xff]  ;;  %v452_v37 = vrot.slane %v421_v28, 4  ;;  %v458_v38 = vrot.slane %v422_v29, 4  ;;  %v464_v41 = vrot.slane %v423_v33, 4  ;;  %v1861_v51 = vld [vmem:[%s393_s18 + $0x8] sm:$0xff] }
  0x6b   : > { %1271 = vmatpush3.bf16.msra.mxu0 %v1268_v9  ;;  %v435_v39 = vadd.f32 %v434_v30, %v418_v23  ;;  %v441_v40 = vadd.f32 %v440_v31, %v419_v24  ;;  %v470_v42 = vrot.slane %v424_v34, 4  ;;  %v447_v43 = vadd.f32 %v446_v36, %v420_v27  ;;  %706 = vperm.xlu1 %1392, %v1861_v51   ;;  %v1864_v56 = vld [vmem:[%s393_s18] sm:$0xff]  ;;  %v427_v17 = vld [vmem:[%s1822_s19 + $0x48] sm:$0xff]  ;;  %v428_v18 = vld [vmem:[%s1822_s19 + $0x50] sm:$0xff]  ;;  %s2035_s18 = scalar_lea.hbm %s2135_s6, %s2143_s9  ;;  %s983_s21 = scalar_lea.sflag [#allocation5], %s1818_s10 }
  0x6c   : > { %1273 = vmatprep.subr.bf16.mxu0 %v1272_v19  ;;  %v453_v44 = vadd.f32 %v452_v37, %v421_v28  ;;  %v459_v45 = vadd.f32 %v458_v38, %v422_v29  ;;  %v476_v46 = vrot.slane %v425_v35, 4  ;;  %v465_v49 = vadd.f32 %v464_v41, %v423_v33  ;;  %687 = vperm.xlu0 %1390, %v1864_v56   ;;  %v426_v11 = vld [vmem:[%s1822_s19 + $0x40] sm:$0xff]  ;;  %v429_v27 = vld [vmem:[%s1822_s19 + $0x58] sm:$0xff]  ;;  %v431_v31 = vld [vmem:[%s1822_s19 + $0x68] sm:$0xff]  ;;  %s1616_s22 = smov [#allocation8]  }
  0x6d   : > { %v436_v47 = vrot.slane %v435_v39, 2  ;;  %v442_v48 = vrot.slane %v441_v40, 2  ;;  %v471_v50 = vadd.f32 %v470_v42, %v424_v34  ;;  %v448_v52 = vrot.slane %v447_v43, 2  ;;  %v430_v28 = vld [vmem:[%s1822_s19 + $0x60] sm:$0xff] }
  0x6e   : > { %v454_v53 = vrot.slane %v453_v44, 2  ;;  %v460_v54 = vrot.slane %v459_v45, 2  ;;  %v477_v55 = vadd.f32 %v476_v46, %v425_v35  ;;  %v466_v59 = vrot.slane %v465_v49, 2 }
  0x6f   : > { %1275 = vmatpush3.bf16.msra.mxu0 %v1272_v19  ;;  %v437_v57 = vadd.f32 %v436_v47, %v435_v39  ;;  %v443_v58 = vadd.f32 %v442_v48, %v441_v40  ;;  %v472_v60 = vrot.slane %v471_v50, 2  ;;  %v449_v61 = vadd.f32 %v448_v52, %v447_v43  ;;  %1394 = vset.pattern.permute.xlu1 %v1606_v12  ;;  %v432_v47 = vld [vmem:[%s1822_s19 + $0x70] sm:$0xff] }
  0x70   : > { %1277 = vmatprep.subr.bf16.mxu0 %v1838_v20  ;;  %v455_v62 = vadd.f32 %v454_v53, %v453_v44  ;;  %v461_v63 = vadd.f32 %v460_v54, %v459_v45  ;;  %v478_v2 = vrot.slane %v477_v55, 2  ;;  %v467_v5 = vadd.f32 %v466_v59, %v465_v49  ;;  %722 = vperm.xlu1 %1394, %v1861_v51   ;;  %v433_v53 = vld [vmem:[%s1822_s19 + $0x78] sm:$0xff]  ;;  %s1001_s19 = sshll.u32 %s1954_s14, 4  ;;  %s2027_s19 = int_to_ptr.vmem [resolvable:$true] %s1001_s19 }
  0x71   : > { %v438_v3 = vrot.slane %v437_v57, 1  ;;  %v444_v4 = vrot.slane %v443_v58, 1  ;;  %v473_v6 = vadd.f32 %v472_v60, %v471_v50  ;;  %v450_v7 = vrot.slane %v449_v61, 1  ;;  %690 = vperm.xlu0 %1390, %v1861_v51   ;;  %s1480_s20 = scalar_lea.vmem %s2027_s19, 256 }
  0x72   : > { %v456_v8 = vrot.slane %v455_v62, 1  ;;  %v462_v9 = vrot.slane %v461_v63, 1  ;;  %v479_v10 = vadd.f32 %v478_v2, %v477_v55  ;;  %v468_v15 = vrot.slane %v467_v5, 1  ;;  %p1481_p6 = scmp.ne.s32.totalorder %s2027_s19, %s1480_s20 }
  0x73   : > { %1279 = vmatpush3.bf16.msra.mxu0 %v1838_v20  ;;  %v439_v13 = vadd.f32 %v438_v3, %v437_v57  ;;  %v445_v14 = vadd.f32 %v444_v4, %v443_v58  ;;  %v474_v16 = vrot.slane %v473_v6, 1  ;;  %v451_v19 = vadd.f32 %v450_v7, %v449_v61 }
  0x74   : > { %1281 = vmatprep.subr.bf16.mxu0 %v1840_v21  ;;  %v457_v22 = vadd.f32 %v456_v8, %v455_v62  ;;  %v463_v23 = vadd.f32 %v462_v9, %v461_v63  ;;  %v480_v24 = vrot.slane %v479_v10, 1  ;;  %v469_v20 = vadd.f32 %v468_v15, %v467_v5  ;;  %p1482_p8 = pnand %p1481_p6, %p1759_p10 }
  0x75   : > { %v475_v29 = vadd.f32 %v474_v16, %v473_v6  ;;  %v547_v30 = vsel %vm546_vm0, %v445_v14, %v439_v13  ;;  %v482_v33 = vrot.slane %v426_v11, 4  ;;  %v488_v36 = vrot.slane %v427_v17, 4  ;;  %1391 = vset.pattern.permute.xlu0 %v1604_v0 }
  0x76   : > { %v481_v34 = vadd.f32 %v480_v24, %v479_v10  ;;  %v549_v35 = vsel %vm548_vm1, %v451_v19, %v547_v30  ;;  %v494_v37 = vrot.slane %v428_v18, 4  ;;  %v500_v40 = vrot.slane %v429_v27, 4  ;;  %703 = vperm.xlu0 %1391, %v1864_v56   ;;  %p1483_p12 = pneg %p1482_p8 }
  0x77   : > { %1283 = vmatpush3.bf16.msra.mxu0 %v1840_v21  ;;  %v551_v38 = vsel %vm550_vm2, %v457_v22, %v549_v35  ;;  %v483_v39 = vadd.f32 %v482_v33, %v426_v11  ;;  %v506_v41 = vrot.slane %v430_v28, 4  ;;  %v1607_v42 = vmov 3  }
  0x78   : > { %1395 = vset.pattern.permute.xlu1 %v1607_v42  ;;  %1285 = vmatprep.subr.bf16.mxu0 %v1844_v25  ;;  %v553_v43 = vsel %vm552_vm3, %v463_v23, %v551_v38  ;;  %v489_v44 = vadd.f32 %v488_v36, %v427_v17  ;;  %v495_v45 = vadd.f32 %v494_v37, %v428_v18  ;;  %v512_v46 = vrot.slane %v431_v31, 4 }
  0x79   : > { %735 = vperm.xlu1 %1395, %v1864_v56   ;;  %v555_v21 = vsel %vm554_vm4, %v469_v20, %v553_v43  ;;  %v484_v48 = vrot.slane %v483_v39, 2  ;;  %v501_v49 = vadd.f32 %v500_v40, %v429_v27  ;;  %v507_v50 = vadd.f32 %v506_v41, %v430_v28 }
  0x7a   : > { %v557_v52 = vsel %vm556_vm5, %v475_v29, %v555_v21  ;;  %v490_v54 = vrot.slane %v489_v44, 2  ;;  %v496_v55 = vrot.slane %v495_v45, 2  ;;  %v513_v57 = vadd.f32 %v512_v46, %v431_v31  ;;  %1393 = vset.pattern.permute.xlu0 %v1606_v12 }
  0x7b   : > { %1287 = vmatpush3.bf16.msra.mxu0 %v1844_v25  ;;  %v559_v58 = vsel %vm558_vm6, %v481_v34, %v557_v52  ;;  %v485_v59 = vadd.f32 %v484_v48, %v483_v39  ;;  %v502_v60 = vrot.slane %v501_v49, 2  ;;  %v508_v61 = vrot.slane %v507_v50, 2  ;;  %719 = vperm.xlu0 %1393, %v1864_v56  }
  0x7c   : > { %1289 = vmatprep.subr.bf16.mxu0 %v1846_v26  ;;  %1261 = vmatprep.mubr.f32.mxu0 %v559_v58  ;;  %v491_v62 = vadd.f32 %v490_v54, %v489_v44  ;;  %v497_v63 = vadd.f32 %v496_v55, %v495_v45  ;;  %v514_v2 = vrot.slane %v513_v57, 2  ;;  %v518_v3 = vrot.slane %v432_v47, 4 }
  0x7d   : > { %v486_v4 = vrot.slane %v485_v59, 1  ;;  %v503_v5 = vadd.f32 %v502_v60, %v501_v49  ;;  %v509_v6 = vadd.f32 %v508_v61, %v507_v50  ;;  %v524_v7 = vrot.slane %v433_v53, 4 }
  0x7e   : > { %v1608_v8 = vmov 4   ;;  %v492_v9 = vrot.slane %v491_v62, 1  ;;  %v498_v25 = vrot.slane %v497_v63, 1  ;;  %v515_v10 = vadd.f32 %v514_v2, %v513_v57 }
  0x7f   : > { %1397 = vset.pattern.permute.xlu1 %v1608_v8  ;;  %v519_v11 = vadd.f32 %v518_v3, %v432_v47  ;;  %1291 = vmatpush3.bf16.msra.mxu0 %v1846_v26  ;;  %v487_v13 = vadd.f32 %v486_v4, %v485_v59  ;;  %v504_v14 = vrot.slane %v503_v5, 1  ;;  %v510_v15 = vrot.slane %v509_v6, 1 }
  0x80   : > { %751 = vperm.xlu1 %1397, %v1864_v56   ;;  %v525_v16 = vadd.f32 %v524_v7, %v433_v53  ;;  %1293 = vmatprep.subr.bf16.mxu0 %v1851_v32  ;;  %v493_v17 = vadd.f32 %v492_v9, %v491_v62  ;;  %v499_v18 = vadd.f32 %v498_v25, %v497_v63  ;;  %v516_v19 = vrot.slane %v515_v10, 1  ;;  %v1198_v63 = vld [vmem:[%s2131_s2] ss:$0 sm:$0xff] }
  0x81   : > { %v520_v22 = vrot.slane %v519_v11, 2  ;;  %v505_v23 = vadd.f32 %v504_v14, %v503_v5  ;;  %v511_v24 = vadd.f32 %v510_v15, %v509_v6  ;;  %1396 = vset.pattern.permute.xlu0 %v1607_v42  ;;  %v1609_v38 = vmov 6  }
  0x82   : > { %v526_v27 = vrot.slane %v525_v16, 2  ;;  %v517_v28 = vadd.f32 %v516_v19, %v515_v10  ;;  %v560_v29 = vsel %vm546_vm0, %v493_v17, %v487_v13  ;;  %738 = vperm.xlu0 %1396, %v1861_v51   ;;  %v1610_v40 = vmov 7  }
  0x83   : > { %v521_v20 = vadd.f32 %v520_v22, %v519_v11  ;;  %1295 = vmatpush3.bf16.msra.mxu0 %v1851_v32  ;;  %v561_v30 = vsel %vm548_vm1, %v499_v18, %v560_v29  ;;  %v1611_v43 = vmov 5   ;;  %v1612_v44 = vmov 9  }
  0x84   : > { %754 = vperm.xlu1 %1397, %v1861_v51   ;;  %v527_v26 = vadd.f32 %v526_v27, %v525_v16  ;;  %v562_v33 = vsel %vm550_vm2, %v505_v23, %v561_v30  ;;  %v1613_v45 = vmov 10   ;;  %v1614_v46 = vmov 8  }
  0x85   : > { %v522_v31 = vrot.slane %v521_v20, 1  ;;  %v563_v35 = vsel %vm552_vm3, %v511_v24, %v562_v33  ;;  %v1615_v21 = vmov 11  }
  0x86   : > { %v528_v34 = vrot.slane %v527_v26, 1  ;;  %v564_v37 = vsel %vm554_vm4, %v517_v28, %v563_v35  ;;  %1400 = vset.pattern.permute.xlu0 %v1610_v40 }
  0x87   : > { %v523_v36 = vadd.f32 %v522_v31, %v521_v20  ;;  %802 = vperm.xlu0 %1400, %v1861_v51  }
  0x88   : > { %1398 = vset.pattern.permute.xlu1 %v1609_v38  ;;  %v529_v39 = vadd.f32 %v528_v34, %v527_v26 }
  0x89   : > { %783 = vperm.xlu1 %1398, %v1864_v56   ;;  %v565_v32 = vsel %vm556_vm5, %v523_v36, %v564_v37 }
  0x8a   : > { %v566_v41 = vsel %vm558_vm6, %v529_v39, %v565_v32 }
  0x8b   : > { %1262 = vmatmul.mubr.f32.vlgmr.msra.gmra.mrb[0].mxu0 %v566_v41  ;;  %1406 = vset.pattern.permute.xlu0 %v1605_v1 }
  0x8d   : > { %786 = vperm.xlu1 %1398, %v1861_v51  }
  0x91   : > { %1399 = vset.pattern.permute.xlu1 %v1610_v40 }
  0x92   : > { %799 = vperm.xlu1 %1399, %v1864_v56  }
  0x96   : > { %1401 = vset.pattern.permute.xlu1 %v1611_v43 }
  0x97   : > { %767 = vperm.xlu1 %1401, %v1864_v56  }
  0x9b   : > { %770 = vperm.xlu1 %1401, %v1861_v51  }
  0x9f   : > { %1402 = vset.pattern.permute.xlu1 %v1612_v44 }
  0xa0   : > { %831 = vperm.xlu1 %1402, %v1864_v56  }
  0xa4   : > { %834 = vperm.xlu1 %1402, %v1861_v51  }
  0xa8   : > { %1403 = vset.pattern.permute.xlu1 %v1613_v45 }
  0xa9   : > { %847 = vperm.xlu1 %1403, %v1864_v56  }
  0xad   : > { %850 = vperm.xlu1 %1403, %v1861_v51  }
  0xb1   : > { %1404 = vset.pattern.permute.xlu1 %v1614_v46 }
  0xb2   : > { %815 = vperm.xlu1 %1404, %v1864_v56  }
  0xb6   : > { %818 = vperm.xlu1 %1404, %v1861_v51  }
  0xba   : > { %1405 = vset.pattern.permute.xlu1 %v1615_v21 }
  0xbb   : > { %863 = vperm.xlu1 %1405, %v1864_v56  }
  0xbf   : > { %866 = vperm.xlu1 %1405, %v1861_v51   ;;  %v684_v51 = vlaneseq }
  0xc1   : > { %v1942_v5 = vand.u32 127, %v684_v51 }
  0xc3   : > { %1407 = vset.pattern.permute.xlu1 %v1604_v0 }
  0xea   : > { %v707_v47 = vpop.permute.xlu1 %706 }
  0xeb   : > { %v688_v55 = vpop.permute.xlu0 %687  ;;  %vm709_vm10 = vcmp.eq.s32.totalorder %v1942_v5, %v707_v47 }
  0xec   : > { %vm692_vm11 = vcmp.eq.s32.totalorder %v1942_v5, %v688_v55 }
  0xef   : > { %v723_v48 = vpop.permute.xlu1 %722 }
  0xf0   : > { %v691_v58 = vpop.permute.xlu0 %690  ;;  %vm725_vm7 = vcmp.eq.s32.totalorder %v1942_v5, %v723_v48 }
  0xf1   : > { %vm693_vm8 = vcmp.eq.s32.totalorder %v1942_v5, %v691_v58 }
  0xf5   : > { %v704_v56 = vpop.permute.xlu0 %703 }
  0xf6   : > { %vm708_vm12 = vcmp.eq.s32.totalorder %v1942_v5, %v704_v56 }
  0xf8   : > { %v736_v49 = vpop.permute.xlu1 %735 }
  0xf9   : > { %vm740_vm15 = vcmp.eq.s32.totalorder %v1942_v5, %v736_v49 }
  0xfa   : > { %v720_v61 = vpop.permute.xlu0 %719 }
  0xfb   : > { %vm724_vm14 = vcmp.eq.s32.totalorder %v1942_v5, %v720_v61 }
  0xff   : > { %v1928_v50 = vpop.permute.xlu1 %751 }
 0x100   : > { %vm756_vm1 = vcmp.eq.s32.totalorder %v1942_v5, %v1928_v50 }
 0x101   : > { %v739_v9 = vpop.permute.xlu0 %738 }
 0x102   : > { %vm741_vm9 = vcmp.eq.s32.totalorder %v1942_v5, %v739_v9 }
 0x103   : > { %v755_v52 = vpop.permute.xlu1 %754 }
 0x104   : > { %vm757_vm13 = vcmp.eq.s32.totalorder %v1942_v5, %v755_v52 }
 0x106   : > { %v803_v27 = vpop.permute.xlu0 %802 }
 0x107   : > { %vm805_vm3 = vcmp.eq.s32.totalorder %v1942_v5, %v803_v27 }
 0x108   : > { %v784_v53 = vpop.permute.xlu1 %783 }
 0x109   : > { %vm788_vm0 = vcmp.eq.s32.totalorder %v1942_v5, %v784_v53 }
 0x10c   : > { %v787_v54 = vpop.permute.xlu1 %786 }
 0x10d   : > { %vm789_vm2 = vcmp.eq.s32.totalorder %v1942_v5, %v787_v54 }
 0x111   : > { %v1930_v57 = vpop.permute.xlu1 %799 }
 0x112   : > { %vm804_vm4 = vcmp.eq.s32.totalorder %v1942_v5, %v1930_v57 }
 0x116   : > { %v1932_v59 = vpop.permute.xlu1 %767 }
 0x117   : > { %vm772_vm5 = vcmp.eq.s32.totalorder %v1942_v5, %v1932_v59 }
 0x11a   : > { %v1934_v60 = vpop.permute.xlu1 %770 }
 0x11b   : > { %vm773_vm6 = vcmp.eq.s32.totalorder %v1942_v5, %v1934_v60 }
 0x11f   : > { %v1940_v2 = vpop.permute.xlu1 %831 }
 0x123   : > { %v835_v11 = vpop.permute.xlu1 %834 }
 0x128   : > { %v848_v15 = vpop.permute.xlu1 %847 }
 0x12c   : > { %v851_v22 = vpop.permute.xlu1 %850 }
 0x131   : > { %v816_v28 = vpop.permute.xlu1 %815 }
 0x135   : > { %v819_v31 = vpop.permute.xlu1 %818 }
 0x13a   : > { %v864_v35 = vpop.permute.xlu1 %863 }
 0x13e   : > { %v867_v32 = vpop.permute.xlu1 %866 }
 0x15e   : > { %v1263_v62 = vpop.f32.mrb[0].mxu0 }
 0x15f   : > { %v670_v3 = vmul.f32 0.03125, %v1263_v62  ;;  %v660_v4 = vpop.f32.mrb[1].mxu0 }
 0x160   : > { %v669_v6 = vmul.f32 0.03125, %v660_v4 }
 0x161   : > { %v1944_v7 = vadd.f32 %v1198_v63, %v670_v3 }
 0x162   : > { %v1948_v8 = vadd.f32 %v1198_v63, %v669_v6 }
 0x163   : > { %v727_v25 = vsel %vm725_vm7, %v1944_v7, 0.0  ;;  %v695_v10 = vsel %vm693_vm8, %v1944_v7, 0.0  ;;  %681 = vst [vmem:[%s1954_s14 + $0x8] sm:$0xff] %v1944_v7  ;;  %v743_v13 = vsel %vm741_vm9, %v1944_v7, 0.0  ;;  %v711_v14 = vsel %vm709_vm10, %v1944_v7, 0.0 }
 0x164   : > { %730 = vadd.xlane.f32.xlu0 %v727_v25  ;;  %698 = vadd.xlane.f32.xlu1 %v695_v10  ;;  %680 = vst [vmem:[%s1954_s14] sm:$0xff] %v1948_v8  ;;  %v710_v16 = vsel %vm708_vm12, %v1948_v8, 0.0  ;;  %v694_v17 = vsel %vm692_vm11, %v1948_v8, 0.0  ;;  %v759_v18 = vsel %vm757_vm13, %v1944_v7, 0.0  ;;  %v726_v19 = vsel %vm724_vm14, %v1948_v8, 0.0  ;;  %s1484_s14 = sshll.u32 %s1616_s22, 4  ;;  %s1485_s14 = int_to_ptr.vmem [resolvable:$false] %s1484_s14 }
 0x165   : > { %v790_v23 = vsel %vm788_vm0, %v1948_v8, 0.0  ;;  %v742_v24 = vsel %vm740_vm15, %v1948_v8, 0.0  ;;  %v791_v20 = vsel %vm789_vm2, %v1944_v7, 0.0  ;;  %v758_v29 = vsel %vm756_vm1, %v1948_v8, 0.0  ;;  %s1486_s15 = scalar_lea.vmem %s1485_s14, 512  ;;  %p1487_p11 = scmp.lt.s32.totalorder %s2027_s19, %s1485_s14 }
 0x166   : > { %v807_v26 = vsel %vm805_vm3, %v1944_v7, 0.0  ;;  %v806_v30 = vsel %vm804_vm4, %v1948_v8, 0.0  ;;  %v775_v33 = vsel %vm773_vm6, %v1944_v7, 0.0  ;;  %v774_v34 = vsel %vm772_vm5, %v1948_v8, 0.0  ;;  %p1488_p0 = scmp.lt.s32.totalorder %s1486_s15, %s1480_s20 }
 0x167   : > { %vm836_vm7 = vcmp.eq.s32.totalorder %v1942_v5, %v1940_v2  ;;  %vm837_vm8 = vcmp.eq.s32.totalorder %v1942_v5, %v835_v11  ;;  %vm852_vm9 = vcmp.eq.s32.totalorder %v1942_v5, %v848_v15  ;;  %vm853_vm10 = vcmp.eq.s32.totalorder %v1942_v5, %v851_v22 }
 0x168   : > { %746 = vadd.xlane.f32.xlu0 %v743_v13  ;;  %714 = vadd.xlane.f32.xlu1 %v711_v14  ;;  %v839_v36 = vsel %vm837_vm8, %v1944_v7, 0.0  ;;  %v838_v37 = vsel %vm836_vm7, %v1948_v8, 0.0  ;;  %v855_v38 = vsel %vm853_vm10, %v1944_v7, 0.0  ;;  %v854_v39 = vsel %vm852_vm9, %v1948_v8, 0.0  ;;  %p1489_p5 = por %p1488_p0, %p1487_p11 }
 0x169   : > { %vm820_vm11 = vcmp.eq.s32.totalorder %v1942_v5, %v816_v28  ;;  %vm821_vm12 = vcmp.eq.s32.totalorder %v1942_v5, %v819_v31  ;;  %vm868_vm13 = vcmp.eq.s32.totalorder %v1942_v5, %v864_v35  ;;  %vm869_vm14 = vcmp.eq.s32.totalorder %v1942_v5, %v867_v32  ;;  %v888_v28 = vld [vmem:[%s399_s30 + $0x8] sm:$0xff] }
 0x16a   : > { %v823_v40 = vsel %vm821_vm12, %v1944_v7, 0.0  ;;  %v822_v41 = vsel %vm820_vm11, %v1948_v8, 0.0  ;;  %v871_v43 = vsel %vm869_vm14, %v1944_v7, 0.0  ;;  %v870_v44 = vsel %vm868_vm13, %v1948_v8, 0.0  ;;  %p1490_p9 = pnand %p1489_p5, %p1483_p12 }
 0x16b   : > { %vm878_vm15 = vcmask 7168   ;;  %vm881_vm0 = vcmask 15360   ;;  %vm884_vm1 = vcmask 23552   ;;  %vm891_vm2 = vcmask 31744  }
 0x16c   : > { %712 = vadd.xlane.f32.xlu0 %v710_v16  ;;  %696 = vadd.xlane.f32.xlu1 %v694_v17 }
 0x170   : > { %762 = vadd.xlane.f32.xlu0 %v759_v18  ;;  %728 = vadd.xlane.f32.xlu1 %v726_v19 }
 0x174   : > { %792 = vadd.xlane.f32.xlu0 %v790_v23  ;;  %744 = vadd.xlane.f32.xlu1 %v742_v24 }
 0x178   : > { %794 = vadd.xlane.f32.xlu0 %v791_v20  ;;  %760 = vadd.xlane.f32.xlu1 %v758_v29  ;;  %v887_v20 = vld [vmem:[%s399_s30] sm:$0xff] }
 0x17c   : > { %810 = vadd.xlane.f32.xlu0 %v807_v26  ;;  %808 = vadd.xlane.f32.xlu1 %v806_v30 }
 0x180   : > { %778 = vadd.xlane.f32.xlu0 %v775_v33  ;;  %776 = vadd.xlane.f32.xlu1 %v774_v34 }
 0x184   : > { %842 = vadd.xlane.f32.xlu0 %v839_v36  ;;  %840 = vadd.xlane.f32.xlu1 %v838_v37 }
 0x188   : > { %858 = vadd.xlane.f32.xlu0 %v855_v38  ;;  %856 = vadd.xlane.f32.xlu1 %v854_v39 }
 0x18c   : > { %826 = vadd.xlane.f32.xlu0 %v823_v40  ;;  %824 = vadd.xlane.f32.xlu1 %v822_v41 }
 0x190   : > { %874 = vadd.xlane.f32.xlu0 %v871_v43  ;;  %872 = vadd.xlane.f32.xlu1 %v870_v44 }
 0x1f1   : > { %v731_v45 = vpop.xlane.xlu0 %730  ;;  %v699_v46 = vpop.xlane.xlu1 %698 }
 0x1f5   : > { %v747_v21 = vpop.xlane.xlu0 %746  ;;  %v715_v47 = vpop.xlane.xlu1 %714 }
 0x1f6   : > { %v717_v2 = vadd.f32 %v715_v47, %v699_v46 }
 0x1f8   : > { %v733_v14 = vadd.f32 %v731_v45, %v717_v2 }
 0x1f9   : > { %v713_v48 = vpop.xlane.xlu0 %712  ;;  %v697_v49 = vpop.xlane.xlu1 %696 }
 0x1fa   : > { %v716_v9 = vadd.f32 %v713_v48, %v697_v49 }
 0x1fd   : > { %v763_v50 = vpop.xlane.xlu0 %762  ;;  %v729_v52 = vpop.xlane.xlu1 %728 }
 0x1fe   : > { %v765_v3 = vadd.f32 %v763_v50, %v747_v21  ;;  %v732_v15 = vadd.f32 %v729_v52, %v716_v9 }
 0x201   : > { %v793_v53 = vpop.xlane.xlu0 %792  ;;  %v745_v54 = vpop.xlane.xlu1 %744 }
 0x205   : > { %v795_v55 = vpop.xlane.xlu0 %794  ;;  %v761_v57 = vpop.xlane.xlu1 %760 }
 0x206   : > { %v764_v4 = vadd.f32 %v761_v57, %v745_v54 }
 0x209   : > { %v811_v58 = vpop.xlane.xlu0 %810  ;;  %v809_v59 = vpop.xlane.xlu1 %808 }
 0x20a   : > { %v813_v5 = vadd.f32 %v811_v58, %v795_v55  ;;  %v812_v6 = vadd.f32 %v809_v59, %v793_v53 }
 0x20d   : > { %v779_v56 = vpop.xlane.xlu0 %778  ;;  %v777_v60 = vpop.xlane.xlu1 %776 }
 0x20e   : > { %v781_v25 = vadd.f32 %v779_v56, %v765_v3  ;;  %v780_v10 = vadd.f32 %v777_v60, %v764_v4 }
 0x210   : > { %v880_v22 = vsel %vm878_vm15, %v733_v14, %v781_v25  ;;  %v879_v23 = vsel %vm878_vm15, %v732_v15, %v780_v10 }
 0x211   : > { %v843_v51 = vpop.xlane.xlu0 %842  ;;  %v841_v61 = vpop.xlane.xlu1 %840 }
 0x215   : > { %v859_v62 = vpop.xlane.xlu0 %858  ;;  %v857_v63 = vpop.xlane.xlu1 %856 }
 0x216   : > { %v861_v16 = vadd.f32 %v859_v62, %v843_v51  ;;  %v860_v17 = vadd.f32 %v857_v63, %v841_v61 }
 0x219   : > { %v827_v7 = vpop.xlane.xlu0 %826  ;;  %v825_v8 = vpop.xlane.xlu1 %824 }
 0x21a   : > { %v829_v11 = vadd.f32 %v827_v7, %v813_v5  ;;  %v828_v13 = vadd.f32 %v825_v8, %v812_v6 }
 0x21c   : > { %v883_v29 = vsel %vm881_vm0, %v880_v22, %v829_v11  ;;  %v882_v26 = vsel %vm881_vm0, %v879_v23, %v828_v13 }
 0x21d   : > { %v875_v18 = vpop.xlane.xlu0 %874  ;;  %v873_v19 = vpop.xlane.xlu1 %872 }
 0x21e   : > { %v877_v24 = vadd.f32 %v875_v18, %v861_v16  ;;  %v876_v27 = vadd.f32 %v873_v19, %v860_v17 }
 0x220   : > { %v886_v30 = vsel %vm884_vm1, %v883_v29, %v877_v24  ;;  %v885_v31 = vsel %vm884_vm1, %v882_v26, %v876_v27 }
 0x221   : > { %v890_v33 = vadd.f32 %v888_v28, %v886_v30  ;;  %v889_v34 = vadd.f32 %v887_v20, %v885_v31 }
 0x223   : > { %v895_v35 = vsel %vm891_vm2, %v890_v33, -inf  ;;  %v892_v36 = vsel %vm891_vm2, %v889_v34, -inf }
 0x224   : > { %896 = vmax.xlane.f32.xlu0 %v895_v35  ;;  %893 = vmax.xlane.f32.xlu1 %v892_v36 }
 0x2b1   : > { %v897_v37 = vpop.xlane.xlu0 %896  ;;  %v894_v38 = vpop.xlane.xlu1 %893 }
 0x2b2   : > { %v899_v39 = vsub.f32 %v890_v33, %v897_v37  ;;  %v898_v32 = vsub.f32 %v889_v34, %v894_v38 }
 0x2b4   : > { %v902_v40 = vmul.f32 1.442695, %v899_v39  ;;  %v900_v41 = vmul.f32 1.442695, %v898_v32 }
 0x2b6   : > { %1414 = vpow2.f32 %v902_v40 }
 0x2b7   : > { %1416 = vpow2.f32 %v900_v41 }
 0x2c0   : > { %v1415_v43 = vpop.eup %1414 }
 0x2c1   : > { %v1417_v44 = vpop.eup %1416  ;;  %v907_v45 = vsel %vm891_vm2, %v1415_v43, 0.0 }
 0x2c2   : > { %908 = vadd.xlane.f32.xlu0 %v907_v45  ;;  %v904_v46 = vsel %vm891_vm2, %v1417_v44, 0.0 }
 0x2c3   : > { %905 = vadd.xlane.f32.xlu1 %v904_v46 }
 0x34f   : > { %v909_v21 = vpop.xlane.xlu0 %908 }
 0x350   : > { %1418 = vrcp.f32 %v909_v21  ;;  %v906_v47 = vpop.xlane.xlu1 %905 }
 0x351   : > { %1420 = vrcp.f32 %v906_v47 }
 0x35a   : > { %v1419_v48 = vpop.eup %1418 }
 0x35b   : > { %v913_v49 = vmul.f32 %v1419_v48, %v1415_v43  ;;  %v1421_v50 = vpop.eup %1420 }
 0x35c   : > { %v911_v52 = vmul.f32 %v1421_v50, %v1417_v44 }
 0x35d   : > { %925 = vperm.xlu0 %1406, %v913_v49   ;;  %941 = vperm.xlu1 %1407, %v913_v49  }
 0x361   : > { %1408 = vset.pattern.permute.xlu1 %v1606_v12  ;;  %1413 = vset.pattern.permute.xlu0 %v1607_v42 }
 0x362   : > { %957 = vperm.xlu1 %1408, %v913_v49  }
 0x366   : > { %1409 = vset.pattern.permute.xlu1 %v1605_v1 }
 0x367   : > { %920 = vperm.xlu1 %1409, %v911_v52  }
 0x36b   : > { %1410 = vset.pattern.permute.xlu1 %v1604_v0 }
 0x36c   : > { %937 = vperm.xlu1 %1410, %v911_v52  }
 0x370   : > { %1411 = vset.pattern.permute.xlu1 %v1606_v12 }
 0x371   : > { %953 = vperm.xlu1 %1411, %v911_v52  }
 0x375   : > { %1412 = vset.pattern.permute.xlu1 %v1607_v42 }
 0x376   : > { %969 = vperm.xlu1 %1412, %v911_v52  }
 0x37a   : > { %973 = vperm.xlu1 %1412, %v913_v49  }
 0x37b   : > { %1493 = shalt.err (!%p1490_p9)
}
 0x37c   : > { %s1494_s30 = scalar_lea.hbm %s2035_s18, 256  ;;  %s1498_s22 = scalar_lea.hbm %s2135_s6, 512 }
 0x37d   : > { %p1495_p1 = scmp.ne.s32.totalorder %s2035_s18, %s1494_s30  ;;  %p1499_p7 = scmp.lt.u32.totalorder %s2035_s18, %s2135_s6 }
 0x37e   : > { %p1500_p13 = scmp.lt.u32.totalorder %s1498_s22, %s1494_s30  ;;  %p1502_p6 = scmp.lt.u32.totalorder %s1494_s30, %s2035_s18 }
 0x37f   : > { %p1496_p2 = pnand %p1495_p1, %p1759_p10 }
 0x380   : > { %p1501_p4 = por %p1500_p13, %p1499_p7 }
 0x381   : > { %p1497_p3 = pneg %p1496_p2 }
 0x382   : > { %p1503_p8 = por %p1502_p6, %p1501_p4 }
 0x384   : > { %p1504_p12 = pnand %p1503_p8, %p1497_p3 }
 0x386   : > { %1507 = shalt.err (!%p1504_p12)
}
 0x387   : > { %s1617_s20 = smov 128   ;;  %s1618_s15 = smov 8  }
 0x388   : > { %1302 = dma.vmem_to_hbm [thread:$0]  (%p1759_p10), %s2027_s19, 256, %s2035_s18, %s983_s21, %s1617_s20, %s1617_s20, %s1618_s15  }
 0x389   : > { %s1208_s9 = sshll.u32 %s2172_s1, 4  ;;  %s387_s1 = scalar_lea.vmem [#allocation9], %s1189_s23 }
 0x38a   : > { %s406_s13 = scalar_lea.vmem %s2134_s5, %s1208_s9  ;;  %s1017_s19 = sshll.u32 %s387_s1, 4  ;;  %s2070_s19 = int_to_ptr.vmem [resolvable:$true] %s1017_s19 }
 0x38b   : > { %v914_v42 = vld [vmem:[%s406_s13] sm:$0xff]   ;;  %v948_v54 = vld [vmem:[%s406_s13 + $0x8] sm:$0xff]   ;;  %v915_v57 = vld [vmem:[%s406_s13 + $0x10] sm:$0xff]   ;;  %s2161_s18 = sshll.u32 %s1590_s27, 8  ;;  %s988_s23 = scalar_lea.sflag [#allocation10], %s1818_s10 }
 0x38c   : > { %v934_v55 = vunpack.c.h.bf16 %v914_v42  ;;  %v916_v58 = vunpack.c.l.bf16 %v914_v42  ;;  %v950_v59 = vunpack.c.l.bf16 %v948_v54  ;;  %v949_v56 = vld [vmem:[%s406_s13 + $0x18] sm:$0xff]   ;;  %v917_v60 = vunpack.c.l.bf16 %v915_v57  ;;  %s2077_s14 = scalar_lea.hbm %s2136_s7, %s2161_s18  ;;  %s1508_s9 = scalar_lea.vmem %s2070_s19, 256 }
 0x38d   : > { %v935_v51 = vunpack.c.h.bf16 %v915_v57  ;;  %v951_v2 = vunpack.c.l.bf16 %v949_v56  ;;  %v966_v5 = vunpack.c.h.bf16 %v948_v54  ;;  %v967_v13 = vunpack.c.h.bf16 %v949_v56  ;;  %p1509_p11 = scmp.ne.s32.totalorder %s2070_s19, %s1508_s9  ;;  %s1619_s30 = smov [#allocation9]  }
 0x38e   : > { %s1512_s11 = sshll.u32 %s1619_s30, 4  ;;  %s1513_s11 = int_to_ptr.vmem [resolvable:$false] %s1512_s11 }
 0x38f   : > { %p1510_p0 = pnand %p1509_p11, %p1759_p10  ;;  %s1514_s13 = scalar_lea.vmem %s1513_s11, 512 }
 0x390   : > { %p1515_p9 = scmp.lt.s32.totalorder %s2070_s19, %s1513_s11  ;;  %p1516_p1 = scmp.lt.s32.totalorder %s1514_s13, %s1508_s9 }
 0x391   : > { %p1511_p5 = pneg %p1510_p0 }
 0x392   : > { %p1517_p2 = por %p1516_p1, %p1515_p9 }
 0x394   : > { %p1518_p3 = pnand %p1517_p2, %p1511_p5 }
 0x3dc   : > { %v942_v0 = vpop.permute.xlu1 %941  ;;  %v926_v63 = vpop.permute.xlu0 %925 }
 0x3dd   : > { %v929_v6 = vmul.f32 %v926_v63, %v917_v60  ;;  %v945_v7 = vmul.f32 %v942_v0, %v935_v51 }
 0x3df   : > { %v947_v14 = vadd.f32 %v945_v7, %v929_v6 }
 0x3e1   : > { %v958_v1 = vpop.permute.xlu1 %957 }
 0x3e2   : > { %v961_v25 = vmul.f32 %v958_v1, %v951_v2 }
 0x3e4   : > { %v963_v17 = vadd.f32 %v961_v25, %v947_v14 }
 0x3e6   : > { %v921_v12 = vpop.permute.xlu1 %920 }
 0x3e7   : > { %v928_v3 = vmul.f32 %v921_v12, %v916_v58 }
 0x3eb   : > { %v938_v53 = vpop.permute.xlu1 %937 }
 0x3ec   : > { %v944_v61 = vmul.f32 %v938_v53, %v934_v55 }
 0x3ee   : > { %v946_v8 = vadd.f32 %v944_v61, %v928_v3 }
 0x3f0   : > { %v954_v62 = vpop.permute.xlu1 %953 }
 0x3f1   : > { %v960_v4 = vmul.f32 %v954_v62, %v950_v59 }
 0x3f3   : > { %v962_v10 = vadd.f32 %v960_v4, %v946_v8 }
 0x3f5   : > { %v970_v9 = vpop.permute.xlu1 %969 }
 0x3f6   : > { %v976_v11 = vmul.f32 %v970_v9, %v966_v5 }
 0x3f8   : > { %v978_v15 = vadd.f32 %v976_v11, %v962_v10 }
 0x3f9   : > { %v974_v16 = vpop.permute.xlu1 %973 }
 0x3fa   : > { %980 = vst [vmem:[%s387_s1] sm:$0xff] %v978_v15  ;;  %v977_v18 = vmul.f32 %v974_v16, %v967_v13 }
 0x3fc   : > { %v979_v19 = vadd.f32 %v977_v18, %v963_v17 }
 0x3fe   : > { %981 = vst [vmem:[%s387_s1 + $0x8] sm:$0xff] %v979_v19 }
 0x3ff   : > { %1521 = shalt.err (!%p1518_p3)
}
 0x400   : > { %s1522_s27 = scalar_lea.hbm %s2077_s14, 256  ;;  %s1526_s21 = scalar_lea.hbm %s2136_s7, 512 }
 0x401   : > { %p1523_p7 = scmp.ne.s32.totalorder %s2077_s14, %s1522_s27  ;;  %p1527_p6 = scmp.lt.u32.totalorder %s2077_s14, %s2136_s7 }
 0x402   : > { %p1528_p8 = scmp.lt.u32.totalorder %s1526_s21, %s1522_s27  ;;  %p1530_p11 = scmp.lt.u32.totalorder %s1522_s27, %s2077_s14 }
 0x403   : > { %p1524_p13 = pnand %p1523_p7, %p1759_p10 }
 0x404   : > { %p1529_p12 = por %p1528_p8, %p1527_p6 }
 0x405   : > { %p1525_p4 = pneg %p1524_p13 }
 0x406   : > { %p1531_p0 = por %p1530_p11, %p1529_p12 }
 0x408   : > { %p1532_p5 = pnand %p1531_p0, %p1525_p4 }
 0x40a   : > { %1535 = shalt.err (!%p1532_p5)
}
 0x40b   : > { %1303 = dma.vmem_to_hbm [thread:$0]  (%p1759_p10), %s2070_s19, 256, %s2077_s14, %s988_s23, %s1617_s20, %s1617_s20, %s1618_s15  }
 0x40c PF: > { %s1032_s9 = sand.u32 1, %s1578_s24   ;;  %p2162_p9 = scmp.ne.s32.totalorder %s2148_s12, 0 }
 0x40d   : > { %p2163_p1 = scmp.ge.s32.totalorder %s1598_s29, 2  ;;  %s1033_s11 = scalar_lea.sflag [#allocation5], %s1032_s9 }
 0x40f   : > { %p1315_p2 = pnand %p2163_p1, %p2162_p9 }
 0x411   : > { %1569 = dma.done.wait (!%p1315_p2), %s1033_s11, 256  }
 0x412   : > { %1571 = vsyncadd (!%p1315_p2), %s1033_s11, 4294967040  ;;  %s1042_s16 = scalar_lea.sflag [#allocation10], %s1032_s9 }
 0x413   : > { %1573 = dma.done.wait (!%p1315_p2), %s1042_s16, 256  }
 0x414   : > { %1575 = vsyncadd (!%p1315_p2), %s1042_s16, 4294967040  ;;  %s28_s29 = sadd.s32 1, %s1598_s29   ;;  %s2164_s24 = smov %s1582_s25 }
 0x415   : > { %p25_p3 = scmp.ge.s32.totalorder %s28_s29, 4   ;;  %s2165_s25 = smov %s1586_s26 }
 0x416   : > { %s2166_s26 = smov %s1768_s8  ;;  %s2167_s27 = smov %s1594_s28 }
 0x417   : > { %s2168_s28 = smov %s2170_s17  ;;  %27 = sbr.rel (!%p25_p3) target bundleno = 11 (0xb), region = 127 }
 0x41e   :  { %1047 = vsyncpa [#allocation4], 1 }
 0x41f   :  { %1049 = vsyncpa [#allocation4 + $0x1], 1 }
 0x420   :  { %1050 = vsyncpa [#allocation7], 1 }
 0x421   :  { %1051 = vsyncpa [#allocation5], 1 }
 0x422   :  { %1053 = vsyncpa [#allocation5 + $0x1], 1 }
 0x423   :  { %1054 = vsyncpa [#allocation10], 1 }
 0x424   :  { %1056 = vsyncpa [#allocation10 + $0x1], 1 }

</bundles_post_ra>
